<compile_context>
chip_gen: v7x
topology: tpu7x:2x2x1
jax: 0.10.0
libtpu: 0.0.40
codegen_flags: <defaults>
</compile_context>

<pallas_src>
import functools

import jax
import jax.numpy as jnp
from jax import lax
from jax.experimental import pallas as pl
from jax.experimental.pallas import tpu as pltpu


# ----------------------------- Pallas kernel ------------------------------- #

def _stem_kernel(xm_ref, xh_ref, w_ref, b_ref, o_ref,
                 ht_ref, patch_ref, carry_ref,
                 *, tr, wo, wop, wout, ho, oc, mask_tail):
    """Fused 7x7/s2 conv (im2col, K=256) + frozen-BN + ReLU + 3x3/s2 max pool.

    All arrays are W-major (output-column leading) so both stride-2 pooling
    decimations only need leading-dim reshapes / tiny sublane slices.

    xm_ref:    (1, Wp2, tr, 16) bf16  s2d rows [i*tr, i*tr+tr)
    xh_ref:    (1, Wp2, 16, 16) bf16  s2d rows [(i+1)*tr, (i+1)*tr+16) (halo)
    w_ref:     (256, OC)        bf16  flattened conv weight (BN scale folded)
    b_ref:     (1, OC)          f32   folded BN bias
    o_ref:     (1, Wout, tr//2, OC) f32  pooled output rows of this tile
    ht_ref:    (Wp2, tr, 64)    bf16  scratch: 4 stacked H-taps
    patch_ref: (WoP, tr, 256)   bf16  scratch: full K=256 im2col tile
    carry_ref: (Wout, 1, OC)    f32   scratch: last W-pooled row (H-pool halo)
    """
    i = pl.program_id(1)

    xm = xm_ref[0]                                     # (Wp2, tr, 16)
    xh = xh_ref[0]                                     # (Wp2, 16, 16)

    # ---- stage 1: stack the 4 H-taps along channels (12 padded to 16) ----
    # ht[u, k, 16*i4 + c] = s2d[col u, row i*tr + k + i4, c]
    ht_ref[:, :, 0:16] = xm
    for i4 in range(1, 4):
        ht_ref[:, 0:tr - i4, 16 * i4:16 * (i4 + 1)] = xm[:, i4:tr, :]
        ht_ref[:, tr - i4:tr, 16 * i4:16 * (i4 + 1)] = xh[:, 0:i4, :]

    # ---- stage 2: stack the 4 W-taps -> lane-dense K = 256 ----------------
    # patch[u, k, 64*j4 + kk] = ht[u + j4, k, kk]
    for j4 in range(4):
        patch_ref[:, :, 64 * j4:64 * (j4 + 1)] = ht_ref[j4:j4 + wop, :, :]

    # ---- one MXU matmul for the whole tile, f32 accumulate ----------------
    lhs = patch_ref[...].reshape(wop * tr, 256)
    y = jnp.dot(lhs, w_ref[...], preferred_element_type=jnp.float32)
    y = jnp.maximum(y + b_ref[...], 0.0)               # BN bias + ReLU
    y = y.reshape(wop, tr, oc)                         # (W, rows, OC)

    if mask_tail:
        # Only the padded tail rows (>= Ho) need zeroing; one block-wide mask.
        rows = lax.broadcasted_iota(jnp.int32, (1, tr, oc), 1) + i * tr
        y = jnp.where(rows < ho, y, 0.0)

    # ---- 1x3 / stride-2 W max pool (zero pad is exact post-ReLU) ----------
    zcol = jnp.zeros((1, tr, oc), jnp.float32)
    pieces = [zcol, y[0:wo]]
    if 2 * wout - wo:
        pieces.append(jnp.zeros((2 * wout - wo, tr, oc), jnp.float32))
    zp = jnp.concatenate(pieces, axis=0)               # (2*wout + 1, tr, oc)
    ev = zp[0:2 * wout].reshape(wout, 2, tr, oc)       # leading-dim split only
    p0 = ev[:, 0]                                      # cols 2p - 1
    p1 = ev[:, 1]                                      # cols 2p
    p2 = jnp.concatenate([p0[1:], zp[2 * wout:2 * wout + 1]], axis=0)  # 2p + 1
    wp = jnp.maximum(jnp.maximum(p0, p1), p2)          # (wout, tr, oc)

    # ---- 3x1 / stride-2 H max pool, fused via a 1-row carry ---------------
    halo = jnp.where(i == 0,
                     jnp.zeros((wout, 1, oc), jnp.float32),
                     carry_ref[...])                   # conv row i*tr - 1
    carry_ref[...] = wp[:, tr - 1:tr, :]               # for the next tile
    hcat = jnp.concatenate([halo, wp], axis=1)         # (wout, tr + 1, oc)
    outs = []
    for j in range(tr // 2):
        a = hcat[:, 2 * j:2 * j + 1, :]
        b = hcat[:, 2 * j + 1:2 * j + 2, :]
        c = hcat[:, 2 * j + 2:2 * j + 3, :]
        outs.append(jnp.maximum(jnp.maximum(a, b), c))
    o_ref[0] = jnp.concatenate(outs, axis=1)           # (wout, tr//2, oc)


# ------------------------------- JAX glue ---------------------------------- #

def frcnn_stem_forward(x_nchw, conv_w, bn_scale, bn_bias, *, tr=16):
    """Conv7x7/s2 + frozen BN + ReLU + MaxPool3x3/s2; hot path in one kernel."""
    B, C, H, W = x_nchw.shape
    OC, Cw, KH, KW = conv_w.shape
    assert (Cw, KH, KW) == (C, 7, 7) and C == 3

    Ho = (H - 1) // 2 + 1            # conv output height (k7, s2, p3)
    Wo = (W - 1) // 2 + 1
    Hout = (Ho - 1) // 2 + 1         # pool output (k3, s2, p1)
    Wout = (Wo - 1) // 2 + 1

    tr = max(16, (int(tr) // 16) * 16)              # conv rows per grid step
    tr = min(tr, pl.cdiv(Ho, 16) * 16)
    HoP = pl.cdiv(Ho, tr) * tr                      # row-padded conv height
    WoP = pl.cdiv(Wo, 16) * 16                      # col-padded conv width
    Wp2 = WoP + 3                                   # s2d columns (incl. taps)
    Hs = HoP + 16                                   # s2d rows (incl. halo)
    Hp = 2 * Hs                                     # padded image height
    Wp = 2 * Wp2                                    # padded image width

    # --- input prep: bf16 first, one pad, one transpose, 2x2 s2d ----------- #
    xb = x_nchw.astype(jnp.bfloat16)
    xp = jnp.pad(xb, ((0, 0), (0, 0), (3, Hp - H - 3), (3, Wp - W - 3)))
    xs = xp.reshape(B, C, Hs, 2, Wp2, 2)
    xs = jnp.transpose(xs, (0, 4, 2, 3, 5, 1))      # (B, Wp2, Hs, dy, dx, C)
    xs = xs.reshape(B, Wp2, Hs, 4 * C)              # channel = dy*6 + dx*3 + c
    xs = jnp.pad(xs, ((0, 0), (0, 0), (0, 0), (0, 4)))   # 12 -> 16 channels

    # --- weight prep: fold BN scale, reorder to the K = 256 patch layout --- #
    ws = (conv_w.astype(jnp.float32)
          * bn_scale.astype(jnp.float32)[:, None, None, None])
    w8 = jnp.pad(ws, ((0, 0), (0, 0), (0, 1), (0, 1)))    # 7x7 -> 8x8 (zeros)
    w6 = w8.reshape(OC, C, 4, 2, 4, 2)                    # (oc, c, i4, dy, j4, dx)
    wt = jnp.transpose(w6, (4, 2, 3, 5, 1, 0)).reshape(4, 4, 12, OC)
    wt = jnp.pad(wt, ((0, 0), (0, 0), (0, 4), (0, 0)))    # 12 -> 16 per tap
    w_mat = wt.reshape(256, OC).astype(jnp.bfloat16)      # K = 64*j4+16*i4+cc
    bias2d = bn_bias.reshape(1, OC).astype(jnp.float32)

    grid = (B, HoP // tr)
    kern = functools.partial(
        _stem_kernel, tr=tr, wo=Wo, wop=WoP, wout=Wout, ho=Ho, oc=OC,
        mask_tail=(HoP > Ho))

    out = pl.pallas_call(
        kern,
        out_shape=jax.ShapeDtypeStruct((B, Wout, HoP // 2, OC), jnp.float32),
        grid_spec=pltpu.PrefetchScalarGridSpec(
            num_scalar_prefetch=0,
            grid=grid,
            in_specs=[
                # main row window of the s2d image
                pl.BlockSpec((1, Wp2, tr, 16), lambda b, i: (b, 0, i, 0)),
                # 16-row halo (same array, next row block)
                pl.BlockSpec((1, Wp2, 16, 16),
                             lambda b, i: (b, 0, (i + 1) * (tr // 16), 0)),
                pl.BlockSpec((256, OC), lambda b, i: (0, 0)),
                pl.BlockSpec((1, OC), lambda b, i: (0, 0)),
            ],
            out_specs=pl.BlockSpec((1, Wout, tr // 2, OC),
                                   lambda b, i: (b, 0, i, 0)),
            scratch_shapes=[
                pltpu.VMEM((Wp2, tr, 64), jnp.bfloat16),    # H-tap stack
                pltpu.VMEM((WoP, tr, 256), jnp.bfloat16),   # im2col tile
                pltpu.VMEM((Wout, 1, OC), jnp.float32),     # H-pool carry
            ],
        ),
        compiler_params=pltpu.CompilerParams(
            dimension_semantics=("parallel", "arbitrary")),
        cost_estimate=pl.CostEstimate(
            flops=int(2 * B * HoP * WoP * 256 * OC),
            transcendentals=0,
            bytes_accessed=int(xs.size * 2 + w_mat.size * 2
                               + B * (HoP // 2) * Wout * OC * 4)),
    )(xs, xs, w_mat, bias2d)

    # Trim padding and return NCHW to match the PyTorch convention.
    # TODO(synk): downstream consumers that accept NHWC could skip this pass.
    return jnp.transpose(out[:, :, :Hout, :], (0, 3, 2, 1))


# ------------------------------ reference ---------------------------------- #

def _reference(x_nchw, conv_w, bn_scale, bn_bias):
    # Mirror the kernel's bf16 MXU operands (accumulation stays f32).
    xq = x_nchw.astype(jnp.bfloat16).astype(jnp.float32)
    wq = (conv_w.astype(jnp.float32)
          * bn_scale.astype(jnp.float32)[:, None, None, None])
    wq = wq.astype(jnp.bfloat16).astype(jnp.float32)
    y = lax.conv_general_dilated(
        xq, wq, window_strides=(2, 2), padding=((3, 3), (3, 3)),
        dimension_numbers=("NCHW", "OIHW", "NCHW"),
        precision=lax.Precision.HIGHEST)
    y = y + bn_bias.astype(jnp.float32)[None, :, None, None]
    y = jnp.maximum(y, 0.0)
    y = lax.reduce_window(
        y, -jnp.inf, lax.max,
        window_dimensions=(1, 1, 3, 3), window_strides=(1, 1, 2, 2),
        padding=((0, 0), (0, 0), (1, 1), (1, 1)))
    return y


# --------------------------------- main ------------------------------------ #

if __name__ == "__main__":
    key = jax.random.PRNGKey(0)
    k_x, k_w, k_g, k_b, k_m, k_v = jax.random.split(key, 6)

    B, C, H, W = 2, 3, 16, 16         # small synthetic image batch (NCHW)
    OC, KH, KW = 64, 7, 7             # ResNet stem of GeneralizedRCNN backbone

    x = jax.random.normal(k_x, (B, C, H, W), dtype=jnp.float32)
    conv_w = jax.random.normal(k_w, (OC, C, KH, KW), dtype=jnp.float32) * 0.05

    # FrozenBatchNorm2d parameters -> folded scale/bias.
    gamma = 1.0 + 0.1 * jax.random.normal(k_g, (OC,), dtype=jnp.float32)
    beta = 0.1 * jax.random.normal(k_b, (OC,), dtype=jnp.float32)
    run_mean = 0.1 * jax.random.normal(k_m, (OC,), dtype=jnp.float32)
    run_var = jnp.abs(jax.random.normal(k_v, (OC,), dtype=jnp.float32)) + 0.5
    eps = 1e-5
    bn_scale = gamma / jnp.sqrt(run_var + eps)
    bn_bias = beta - run_mean * bn_scale

    out = jax.jit(frcnn_stem_forward)(x, conv_w, bn_scale, bn_bias)
    out = jax.block_until_ready(out)

    ref = _reference(x, conv_w, bn_scale, bn_bias)
    assert out.shape == ref.shape, (out.shape, ref.shape)
    max_err = float(jnp.max(jnp.abs(out - ref)))
    assert jnp.allclose(out, ref, atol=1e-2, rtol=1e-2), max_err

    print("KERNEL_OK")
</pallas_src>

<mosaic_0001>
module attributes {stable_mosaic.version = 11 : i64} {
  func.func @_stem_kernel(%arg0: i32, %arg1: i32, %arg2: memref<1x19x16x16xbf16, #tpu.memory_space<vmem>>, %arg3: memref<1x19x16x16xbf16, #tpu.memory_space<vmem>>, %arg4: memref<256x64xbf16, #tpu.memory_space<vmem>>, %arg5: memref<1x64xf32, #tpu.memory_space<vmem>>, %arg6: memref<1x4x8x64xf32, #tpu.memory_space<vmem>>, %arg7: memref<19x16x64xbf16, #tpu.memory_space<vmem>>, %arg8: memref<16x16x256xbf16, #tpu.memory_space<vmem>>, %arg9: memref<4x1x64xf32, #tpu.memory_space<vmem>>) attributes {dimension_semantics = [#tpu.dimension_semantics<parallel>, #tpu.dimension_semantics<arbitrary>], iteration_bounds = array<i64: 2, 1>, scalar_prefetch = 0 : i64, scratch_operands = 3 : i64, tpu.core_type = #tpu.core_type<tc>, window_params = [{transform_indices = @transform_0, window_bounds = array<i64: 1, 19, 16, 16>}, {transform_indices = @transform_1, window_bounds = array<i64: 1, 19, 16, 16>}, {pipeline_mode = #tpu.pipeline_mode<synchronous>, transform_indices = @transform_2, window_bounds = array<i64: 256, 64>}, {pipeline_mode = #tpu.pipeline_mode<synchronous>, transform_indices = @transform_3, window_bounds = array<i64: 1, 64>}, {transform_indices = @transform_4, window_bounds = array<i64: 1, 4, 8, 64>}]} {
    %c0 = arith.constant 0 : index
    %c0_0 = arith.constant 0 : index
    %c0_1 = arith.constant 0 : index
    %c0_2 = arith.constant 0 : index
    %0 = vector.load %arg2[%c0, %c0_0, %c0_1, %c0_2] : memref<1x19x16x16xbf16, #tpu.memory_space<vmem>>, vector<1x19x16x16xbf16>
    %1 = vector.shape_cast %0 : vector<1x19x16x16xbf16> to vector<19x16x16xbf16>
    %c0_3 = arith.constant 0 : index
    %c0_4 = arith.constant 0 : index
    %c0_5 = arith.constant 0 : index
    %c0_6 = arith.constant 0 : index
    %2 = vector.load %arg3[%c0_3, %c0_4, %c0_5, %c0_6] : memref<1x19x16x16xbf16, #tpu.memory_space<vmem>>, vector<1x19x16x16xbf16>
    %3 = vector.shape_cast %2 : vector<1x19x16x16xbf16> to vector<19x16x16xbf16>
    %c0_7 = arith.constant 0 : index
    %c0_8 = arith.constant 0 : index
    %c0_9 = arith.constant 0 : index
    %4 = vector.load %arg7[%c0_7, %c0_8, %c0_9] : memref<19x16x64xbf16, #tpu.memory_space<vmem>>, vector<19x16x16xbf16>
    tpu.vector_store %arg7[%c0_7, %c0_8, %c0_9], %1 {strides = array<i32>} : memref<19x16x64xbf16, #tpu.memory_space<vmem>>, vector<19x16x16xbf16>,
    %5 = vector.extract_strided_slice %1 {offsets = [0, 1, 0], sizes = [19, 15, 16], strides = [1, 1, 1]} : vector<19x16x16xbf16> to vector<19x15x16xbf16>
    %c0_10 = arith.constant 0 : index
    %c0_11 = arith.constant 0 : index
    %c16 = arith.constant 16 : index
    %6 = vector.load %arg7[%c0_10, %c0_11, %c16] : memref<19x16x64xbf16, #tpu.memory_space<vmem>>, vector<19x15x16xbf16>
    tpu.vector_store %arg7[%c0_10, %c0_11, %c16], %5 {strides = array<i32>} : memref<19x16x64xbf16, #tpu.memory_space<vmem>>, vector<19x15x16xbf16>,
    %7 = vector.extract_strided_slice %3 {offsets = [0, 0, 0], sizes = [19, 1, 16], strides = [1, 1, 1]} : vector<19x16x16xbf16> to vector<19x1x16xbf16>
    %c0_12 = arith.constant 0 : index
    %c15 = arith.constant 15 : index
    %c16_13 = arith.constant 16 : index
    %8 = vector.load %arg7[%c0_12, %c15, %c16_13] : memref<19x16x64xbf16, #tpu.memory_space<vmem>>, vector<19x1x16xbf16>
    tpu.vector_store %arg7[%c0_12, %c15, %c16_13], %7 {strides = array<i32>} : memref<19x16x64xbf16, #tpu.memory_space<vmem>>, vector<19x1x16xbf16>,
    %9 = vector.extract_strided_slice %1 {offsets = [0, 2, 0], sizes = [19, 14, 16], strides = [1, 1, 1]} : vector<19x16x16xbf16> to vector<19x14x16xbf16>
    %c0_14 = arith.constant 0 : index
    %c0_15 = arith.constant 0 : index
    %c32 = arith.constant 32 : index
    %10 = vector.load %arg7[%c0_14, %c0_15, %c32] : memref<19x16x64xbf16, #tpu.memory_space<vmem>>, vector<19x14x16xbf16>
    tpu.vector_store %arg7[%c0_14, %c0_15, %c32], %9 {strides = array<i32>} : memref<19x16x64xbf16, #tpu.memory_space<vmem>>, vector<19x14x16xbf16>,
    %11 = vector.extract_strided_slice %3 {offsets = [0, 0, 0], sizes = [19, 2, 16], strides = [1, 1, 1]} : vector<19x16x16xbf16> to vector<19x2x16xbf16>
    %c0_16 = arith.constant 0 : index
    %c14 = arith.constant 14 : index
    %c32_17 = arith.constant 32 : index
    %12 = vector.load %arg7[%c0_16, %c14, %c32_17] : memref<19x16x64xbf16, #tpu.memory_space<vmem>>, vector<19x2x16xbf16>
    tpu.vector_store %arg7[%c0_16, %c14, %c32_17], %11 {strides = array<i32>} : memref<19x16x64xbf16, #tpu.memory_space<vmem>>, vector<19x2x16xbf16>,
    %13 = vector.extract_strided_slice %1 {offsets = [0, 3, 0], sizes = [19, 13, 16], strides = [1, 1, 1]} : vector<19x16x16xbf16> to vector<19x13x16xbf16>
    %c0_18 = arith.constant 0 : index
    %c0_19 = arith.constant 0 : index
    %c48 = arith.constant 48 : index
    %14 = vector.load %arg7[%c0_18, %c0_19, %c48] : memref<19x16x64xbf16, #tpu.memory_space<vmem>>, vector<19x13x16xbf16>
    tpu.vector_store %arg7[%c0_18, %c0_19, %c48], %13 {strides = array<i32>} : memref<19x16x64xbf16, #tpu.memory_space<vmem>>, vector<19x13x16xbf16>,
    %15 = vector.extract_strided_slice %3 {offsets = [0, 0, 0], sizes = [19, 3, 16], strides = [1, 1, 1]} : vector<19x16x16xbf16> to vector<19x3x16xbf16>
    %c0_20 = arith.constant 0 : index
    %c13 = arith.constant 13 : index
    %c48_21 = arith.constant 48 : index
    %16 = vector.load %arg7[%c0_20, %c13, %c48_21] : memref<19x16x64xbf16, #tpu.memory_space<vmem>>, vector<19x3x16xbf16>
    tpu.vector_store %arg7[%c0_20, %c13, %c48_21], %15 {strides = array<i32>} : memref<19x16x64xbf16, #tpu.memory_space<vmem>>, vector<19x3x16xbf16>,
    %c0_22 = arith.constant 0 : index
    %c0_23 = arith.constant 0 : index
    %c0_24 = arith.constant 0 : index
    %17 = vector.load %arg7[%c0_22, %c0_23, %c0_24] : memref<19x16x64xbf16, #tpu.memory_space<vmem>>, vector<16x16x64xbf16>
    %c0_25 = arith.constant 0 : index
    %c0_26 = arith.constant 0 : index
    %c0_27 = arith.constant 0 : index
    %18 = vector.load %arg8[%c0_25, %c0_26, %c0_27] : memref<16x16x256xbf16, #tpu.memory_space<vmem>>, vector<16x16x64xbf16>
    tpu.vector_store %arg8[%c0_25, %c0_26, %c0_27], %17 {strides = array<i32>} : memref<16x16x256xbf16, #tpu.memory_space<vmem>>, vector<16x16x64xbf16>,
    %c1 = arith.constant 1 : index
    %c0_28 = arith.constant 0 : index
    %c0_29 = arith.constant 0 : index
    %19 = vector.load %arg7[%c1, %c0_28, %c0_29] : memref<19x16x64xbf16, #tpu.memory_space<vmem>>, vector<16x16x64xbf16>
    %c0_30 = arith.constant 0 : index
    %c0_31 = arith.constant 0 : index
    %c64 = arith.constant 64 : index
    %20 = vector.load %arg8[%c0_30, %c0_31, %c64] : memref<16x16x256xbf16, #tpu.memory_space<vmem>>, vector<16x16x64xbf16>
    tpu.vector_store %arg8[%c0_30, %c0_31, %c64], %19 {strides = array<i32>} : memref<16x16x256xbf16, #tpu.memory_space<vmem>>, vector<16x16x64xbf16>,
    %c2 = arith.constant 2 : index
    %c0_32 = arith.constant 0 : index
    %c0_33 = arith.constant 0 : index
    %21 = vector.load %arg7[%c2, %c0_32, %c0_33] : memref<19x16x64xbf16, #tpu.memory_space<vmem>>, vector<16x16x64xbf16>
    %c0_34 = arith.constant 0 : index
    %c0_35 = arith.constant 0 : index
    %c128 = arith.constant 128 : index
    %22 = vector.load %arg8[%c0_34, %c0_35, %c128] : memref<16x16x256xbf16, #tpu.memory_space<vmem>>, vector<16x16x64xbf16>
    tpu.vector_store %arg8[%c0_34, %c0_35, %c128], %21 {strides = array<i32>} : memref<16x16x256xbf16, #tpu.memory_space<vmem>>, vector<16x16x64xbf16>,
    %c3 = arith.constant 3 : index
    %c0_36 = arith.constant 0 : index
    %c0_37 = arith.constant 0 : index
    %23 = vector.load %arg7[%c3, %c0_36, %c0_37] : memref<19x16x64xbf16, #tpu.memory_space<vmem>>, vector<16x16x64xbf16>
    %c0_38 = arith.constant 0 : index
    %c0_39 = arith.constant 0 : index
    %c192 = arith.constant 192 : index
    %24 = vector.load %arg8[%c0_38, %c0_39, %c192] : memref<16x16x256xbf16, #tpu.memory_space<vmem>>, vector<16x16x64xbf16>
    tpu.vector_store %arg8[%c0_38, %c0_39, %c192], %23 {strides = array<i32>} : memref<16x16x256xbf16, #tpu.memory_space<vmem>>, vector<16x16x64xbf16>,
    %c0_40 = arith.constant 0 : index
    %c0_41 = arith.constant 0 : index
    %c0_42 = arith.constant 0 : index
    %25 = vector.load %arg8[%c0_40, %c0_41, %c0_42] : memref<16x16x256xbf16, #tpu.memory_space<vmem>>, vector<16x16x256xbf16>
    %26 = vector.shape_cast %25 : vector<16x16x256xbf16> to vector<256x256xbf16>
    %c0_43 = arith.constant 0 : index
    %c0_44 = arith.constant 0 : index
    %27 = vector.load %arg4[%c0_43, %c0_44] : memref<256x64xbf16, #tpu.memory_space<vmem>>, vector<256x64xbf16>
    %cst = arith.constant dense<0.000000e+00> : vector<256x64xf32>
    %28 = tpu.matmul %26, %27, %cst {dimension_numbers = #tpu.dot_dimension_numbers<[1], [0], [0], [1], [0, 0, 1, 1], [], []>} : vector<256x256xbf16>, vector<256x64xbf16>, vector<256x64xf32> -> vector<256x64xf32>
    %c0_45 = arith.constant 0 : index
    %c0_46 = arith.constant 0 : index
    %29 = vector.load %arg5[%c0_45, %c0_46] : memref<1x64xf32, #tpu.memory_space<vmem>>, vector<1x64xf32>
    %30 = vector.broadcast %29 : vector<1x64xf32> to vector<256x64xf32>
    %31 = arith.addf %28, %30 : vector<256x64xf32>
    %cst_47 = arith.constant 0.000000e+00 : f32
    %32 = vector.broadcast %cst_47 : f32 to vector<256x64xf32>
    %33 = arith.maximumf %31, %32 : vector<256x64xf32>
    %34 = vector.shape_cast %33 : vector<256x64xf32> to vector<16x16x64xf32>
    %35 = tpu.iota {dimensions = array<i32: 1>} : vector<1x16x64xi32>
    %c16_i32 = arith.constant 16 : i32
    %36 = arith.muli %arg1, %c16_i32 : i32
    %37 = vector.broadcast %36 : i32 to vector<1x16x64xi32>
    %38 = arith.addi %35, %37 : vector<1x16x64xi32>
    %c8_i32 = arith.constant 8 : i32
    %39 = vector.broadcast %c8_i32 : i32 to vector<1x16x64xi32>
    %40 = arith.cmpi slt, %38, %39 : vector<1x16x64xi32>
    %cst_48 = arith.constant 0.000000e+00 : f32
    %41 = vector.shape_cast %40 : vector<1x16x64xi1> to vector<1x16x64xi1>
    %42 = vector.broadcast %41 : vector<1x16x64xi1> to vector<16x16x64xi1>
    %43 = vector.broadcast %cst_48 : f32 to vector<16x16x64xf32>
    %44 = arith.select %42, %34, %43 : vector<16x16x64xi1>, vector<16x16x64xf32>
    %cst_49 = arith.constant 0.000000e+00 : f32
    %45 = vector.broadcast %cst_49 : f32 to vector<1x16x64xf32>
    %46 = vector.extract_strided_slice %44 {offsets = [0, 0, 0], sizes = [8, 16, 64], strides = [1, 1, 1]} : vector<16x16x64xf32> to vector<8x16x64xf32>
    %47 = tpu.concatenate %45, %46 in 0 : vector<1x16x64xf32>, vector<8x16x64xf32> -> vector<9x16x64xf32>
    %48 = vector.extract_strided_slice %47 {offsets = [0, 0, 0], sizes = [8, 16, 64], strides = [1, 1, 1]} : vector<9x16x64xf32> to vector<8x16x64xf32>
    %49 = vector.shape_cast %48 : vector<8x16x64xf32> to vector<4x2x16x64xf32>
    %50 = vector.extract_strided_slice %49 {offsets = [0, 0, 0, 0], sizes = [4, 1, 16, 64], strides = [1, 1, 1, 1]} : vector<4x2x16x64xf32> to vector<4x1x16x64xf32>
    %51 = vector.shape_cast %50 : vector<4x1x16x64xf32> to vector<4x16x64xf32>
    %52 = vector.extract_strided_slice %49 {offsets = [0, 1, 0, 0], sizes = [4, 1, 16, 64], strides = [1, 1, 1, 1]} : vector<4x2x16x64xf32> to vector<4x1x16x64xf32>
    %53 = vector.shape_cast %52 : vector<4x1x16x64xf32> to vector<4x16x64xf32>
    %54 = vector.extract_strided_slice %51 {offsets = [1, 0, 0], sizes = [3, 16, 64], strides = [1, 1, 1]} : vector<4x16x64xf32> to vector<3x16x64xf32>
    %55 = vector.extract_strided_slice %47 {offsets = [8, 0, 0], sizes = [1, 16, 64], strides = [1, 1, 1]} : vector<9x16x64xf32> to vector<1x16x64xf32>
    %56 = tpu.concatenate %54, %55 in 0 : vector<3x16x64xf32>, vector<1x16x64xf32> -> vector<4x16x64xf32>
    %57 = arith.maximumf %51, %53 : vector<4x16x64xf32>
    %58 = arith.maximumf %57, %56 : vector<4x16x64xf32>
    %c0_i32 = arith.constant 0 : i32
    %59 = arith.cmpi eq, %arg1, %c0_i32 : i32
    %cst_50 = arith.constant 0.000000e+00 : f32
    %60 = vector.broadcast %cst_50 : f32 to vector<4x1x64xf32>
    %c0_51 = arith.constant 0 : index
    %c0_52 = arith.constant 0 : index
    %c0_53 = arith.constant 0 : index
    %61 = vector.load %arg9[%c0_51, %c0_52, %c0_53] : memref<4x1x64xf32, #tpu.memory_space<vmem>>, vector<4x1x64xf32>
    %62 = arith.select %59, %60, %61 : vector<4x1x64xf32>
    %63 = vector.extract_strided_slice %58 {offsets = [0, 15, 0], sizes = [4, 1, 64], strides = [1, 1, 1]} : vector<4x16x64xf32> to vector<4x1x64xf32>
    %c0_54 = arith.constant 0 : index
    %c0_55 = arith.constant 0 : index
    %c0_56 = arith.constant 0 : index
    %64 = vector.load %arg9[%c0_54, %c0_55, %c0_56] : memref<4x1x64xf32, #tpu.memory_space<vmem>>, vector<4x1x64xf32>
    tpu.vector_store %arg9[%c0_54, %c0_55, %c0_56], %63 {strides = array<i32>} : memref<4x1x64xf32, #tpu.memory_space<vmem>>, vector<4x1x64xf32>,
    %65 = tpu.concatenate %62, %58 in 1 : vector<4x1x64xf32>, vector<4x16x64xf32> -> vector<4x17x64xf32>
    %66 = vector.extract_strided_slice %65 {offsets = [0, 0, 0], sizes = [4, 1, 64], strides = [1, 1, 1]} : vector<4x17x64xf32> to vector<4x1x64xf32>
    %67 = vector.extract_strided_slice %65 {offsets = [0, 1, 0], sizes = [4, 1, 64], strides = [1, 1, 1]} : vector<4x17x64xf32> to vector<4x1x64xf32>
    %68 = vector.extract_strided_slice %65 {offsets = [0, 2, 0], sizes = [4, 1, 64], strides = [1, 1, 1]} : vector<4x17x64xf32> to vector<4x1x64xf32>
    %69 = arith.maximumf %66, %67 : vector<4x1x64xf32>
    %70 = arith.maximumf %69, %68 : vector<4x1x64xf32>
    %71 = vector.extract_strided_slice %65 {offsets = [0, 2, 0], sizes = [4, 1, 64], strides = [1, 1, 1]} : vector<4x17x64xf32> to vector<4x1x64xf32>
    %72 = vector.extract_strided_slice %65 {offsets = [0, 3, 0], sizes = [4, 1, 64], strides = [1, 1, 1]} : vector<4x17x64xf32> to vector<4x1x64xf32>
    %73 = vector.extract_strided_slice %65 {offsets = [0, 4, 0], sizes = [4, 1, 64], strides = [1, 1, 1]} : vector<4x17x64xf32> to vector<4x1x64xf32>
    %74 = arith.maximumf %71, %72 : vector<4x1x64xf32>
    %75 = arith.maximumf %74, %73 : vector<4x1x64xf32>
    %76 = vector.extract_strided_slice %65 {offsets = [0, 4, 0], sizes = [4, 1, 64], strides = [1, 1, 1]} : vector<4x17x64xf32> to vector<4x1x64xf32>
    %77 = vector.extract_strided_slice %65 {offsets = [0, 5, 0], sizes = [4, 1, 64], strides = [1, 1, 1]} : vector<4x17x64xf32> to vector<4x1x64xf32>
    %78 = vector.extract_strided_slice %65 {offsets = [0, 6, 0], sizes = [4, 1, 64], strides = [1, 1, 1]} : vector<4x17x64xf32> to vector<4x1x64xf32>
    %79 = arith.maximumf %76, %77 : vector<4x1x64xf32>
    %80 = arith.maximumf %79, %78 : vector<4x1x64xf32>
    %81 = vector.extract_strided_slice %65 {offsets = [0, 6, 0], sizes = [4, 1, 64], strides = [1, 1, 1]} : vector<4x17x64xf32> to vector<4x1x64xf32>
    %82 = vector.extract_strided_slice %65 {offsets = [0, 7, 0], sizes = [4, 1, 64], strides = [1, 1, 1]} : vector<4x17x64xf32> to vector<4x1x64xf32>
    %83 = vector.extract_strided_slice %65 {offsets = [0, 8, 0], sizes = [4, 1, 64], strides = [1, 1, 1]} : vector<4x17x64xf32> to vector<4x1x64xf32>
    %84 = arith.maximumf %81, %82 : vector<4x1x64xf32>
    %85 = arith.maximumf %84, %83 : vector<4x1x64xf32>
    %86 = vector.extract_strided_slice %65 {offsets = [0, 8, 0], sizes = [4, 1, 64], strides = [1, 1, 1]} : vector<4x17x64xf32> to vector<4x1x64xf32>
    %87 = vector.extract_strided_slice %65 {offsets = [0, 9, 0], sizes = [4, 1, 64], strides = [1, 1, 1]} : vector<4x17x64xf32> to vector<4x1x64xf32>
    %88 = vector.extract_strided_slice %65 {offsets = [0, 10, 0], sizes = [4, 1, 64], strides = [1, 1, 1]} : vector<4x17x64xf32> to vector<4x1x64xf32>
    %89 = arith.maximumf %86, %87 : vector<4x1x64xf32>
    %90 = arith.maximumf %89, %88 : vector<4x1x64xf32>
    %91 = vector.extract_strided_slice %65 {offsets = [0, 10, 0], sizes = [4, 1, 64], strides = [1, 1, 1]} : vector<4x17x64xf32> to vector<4x1x64xf32>
    %92 = vector.extract_strided_slice %65 {offsets = [0, 11, 0], sizes = [4, 1, 64], strides = [1, 1, 1]} : vector<4x17x64xf32> to vector<4x1x64xf32>
    %93 = vector.extract_strided_slice %65 {offsets = [0, 12, 0], sizes = [4, 1, 64], strides = [1, 1, 1]} : vector<4x17x64xf32> to vector<4x1x64xf32>
    %94 = arith.maximumf %91, %92 : vector<4x1x64xf32>
    %95 = arith.maximumf %94, %93 : vector<4x1x64xf32>
    %96 = vector.extract_strided_slice %65 {offsets = [0, 12, 0], sizes = [4, 1, 64], strides = [1, 1, 1]} : vector<4x17x64xf32> to vector<4x1x64xf32>
    %97 = vector.extract_strided_slice %65 {offsets = [0, 13, 0], sizes = [4, 1, 64], strides = [1, 1, 1]} : vector<4x17x64xf32> to vector<4x1x64xf32>
    %98 = vector.extract_strided_slice %65 {offsets = [0, 14, 0], sizes = [4, 1, 64], strides = [1, 1, 1]} : vector<4x17x64xf32> to vector<4x1x64xf32>
    %99 = arith.maximumf %96, %97 : vector<4x1x64xf32>
    %100 = arith.maximumf %99, %98 : vector<4x1x64xf32>
    %101 = vector.extract_strided_slice %65 {offsets = [0, 14, 0], sizes = [4, 1, 64], strides = [1, 1, 1]} : vector<4x17x64xf32> to vector<4x1x64xf32>
    %102 = vector.extract_strided_slice %65 {offsets = [0, 15, 0], sizes = [4, 1, 64], strides = [1, 1, 1]} : vector<4x17x64xf32> to vector<4x1x64xf32>
    %103 = vector.extract_strided_slice %65 {offsets = [0, 16, 0], sizes = [4, 1, 64], strides = [1, 1, 1]} : vector<4x17x64xf32> to vector<4x1x64xf32>
    %104 = arith.maximumf %101, %102 : vector<4x1x64xf32>
    %105 = arith.maximumf %104, %103 : vector<4x1x64xf32>
    %106 = tpu.concatenate %70, %75, %80, %85, %90, %95, %100, %105 in 1 : vector<4x1x64xf32>, vector<4x1x64xf32>, vector<4x1x64xf32>, vector<4x1x64xf32>, vector<4x1x64xf32>, vector<4x1x64xf32>, vector<4x1x64xf32>, vector<4x1x64xf32> -> vector<4x8x64xf32>
    %c0_57 = arith.constant 0 : index
    %c0_58 = arith.constant 0 : index
    %c0_59 = arith.constant 0 : index
    %c0_60 = arith.constant 0 : index
    %107 = vector.load %arg6[%c0_57, %c0_58, %c0_59, %c0_60] : memref<1x4x8x64xf32, #tpu.memory_space<vmem>>, vector<1x4x8x64xf32>
    %108 = vector.shape_cast %107 : vector<1x4x8x64xf32> to vector<4x8x64xf32>
    %109 = vector.shape_cast %106 : vector<4x8x64xf32> to vector<1x4x8x64xf32>
    tpu.vector_store %arg6[%c0_57, %c0_58, %c0_59, %c0_60], %109 {strides = array<i32>} : memref<1x4x8x64xf32, #tpu.memory_space<vmem>>, vector<1x4x8x64xf32>,
    return
  }
  func.func @transform_0(%arg0: i32, %arg1: i32) -> (i32, i32, i32, i32) {
    %c0_i32 = arith.constant 0 : i32
    %c0_i32_0 = arith.constant 0 : i32
    %c0_i32_1 = arith.constant 0 : i32
    return %arg0, %c0_i32, %arg1, %c0_i32_0 : i32, i32, i32, i32
  }
  func.func @transform_1(%arg0: i32, %arg1: i32) -> (i32, i32, i32, i32) {
    %c1_i32 = arith.constant 1 : i32
    %0 = arith.addi %arg1, %c1_i32 : i32
    %c1_i32_0 = arith.constant 1 : i32
    %1 = arith.muli %0, %c1_i32_0 : i32
    %c0_i32 = arith.constant 0 : i32
    %c0_i32_1 = arith.constant 0 : i32
    %c0_i32_2 = arith.constant 0 : i32
    return %arg0, %c0_i32, %1, %c0_i32_1 : i32, i32, i32, i32
  }
  func.func @transform_2(%arg0: i32, %arg1: i32) -> (i32, i32) {
    %c0_i32 = arith.constant 0 : i32
    %c0_i32_0 = arith.constant 0 : i32
    %c0_i32_1 = arith.constant 0 : i32
    return %c0_i32, %c0_i32_0 : i32, i32
  }
  func.func @transform_3(%arg0: i32, %arg1: i32) -> (i32, i32) {
    %c0_i32 = arith.constant 0 : i32
    %c0_i32_0 = arith.constant 0 : i32
    %c0_i32_1 = arith.constant 0 : i32
    return %c0_i32, %c0_i32_0 : i32, i32
  }
  func.func @transform_4(%arg0: i32, %arg1: i32) -> (i32, i32, i32, i32) {
    %c0_i32 = arith.constant 0 : i32
    %c0_i32_0 = arith.constant 0 : i32
    %c0_i32_1 = arith.constant 0 : i32
    return %arg0, %c0_i32, %arg1, %c0_i32_0 : i32, i32, i32, i32
  }
}

</mosaic_0001>

<bundles_post_ra>
// kernel: frcnn_stem_forward.1
= control target key start
LH: loop header
LB: loop body
LE: loop exit
PB: predicated region body
PF: predicated region fallthrough
CT: control target
= control target key end

     0   :  { %s3323_s15 = smov 0   ;;  %s3325_s16 = smov 0   ;;  %s4515_s0 = inlined_call_operand.vmem [shape: bf16[2,19,32,16], index: 0, kind: input, shape index: {}, may-alias: {0,1}]   ;;  %s4516_s1 = inlined_call_operand.vmem [shape: bf16[2,19,32,16], index: 1, kind: input, shape index: {}, may-alias: {0,1}]   ;;  %s4517_s2 = inlined_call_operand.vmem [shape: bf16[256,64], index: 2, kind: input, shape index: {}]   ;;  %s4518_s3 = inlined_call_operand.vmem [shape: f32[1,64], index: 3, kind: input, shape index: {}]   ;;  %s4519_s4 = inlined_call_operand.vmem [shape: f32[2,4,8,64], index: 4, kind: output, shape index: {}]  }
   0x1   :  { %s3327_s17 = smov 0   ;;  %s3329_s18 = smov 0  }
   0x2   :  { %s3331_s19 = smov 0  }
   0x3 LB: > { %s26_s20 = sadd.s32 1, %s3287_s18  ;;  %p42_p1 = scmp.ne.s32.totalorder %s3279_s16, %s3275_s15  ;;  %s3291_s19 = sphi %s3331_s19, %s14_s19   ;;  %s3287_s18 = sphi %s3329_s18, %s4532_s18   ;;  %s3283_s17 = sphi %s3327_s17, %s4531_s17   ;;  %s3279_s16 = sphi %s3325_s16, %s4530_s16   ;;  %s3275_s15 = sphi %s3323_s15, %s4529_s15  }
   0x4   : > { %p28_p0 = scmp.ge.s32.totalorder %s26_s20, 2  ;;  %p43_p2 = scmp.eq.s32.totalorder %s3291_s19, 0 }
   0x5   : > { %s35_s23 = sadd.s32 1, %s3279_s16  ;;  %p2875_p5 = scmp.ge.s32.totalorder %s3291_s19, 2 }
   0x6   : > { %s4534_s20 = smov (%p28_p0, %s26_s20), 0  ;;  %p3354_p3 = por %p43_p2, %p42_p1 }
   0x7   : > { %s30_s22 = ssub.s32 %s3287_s18, %s4534_s20  ;;  %174 = sbr.rel (%p2875_p5) target bundleno = 44 (0x2c), region = 24 }
   0x8   : > { %p33_p4 = scmp.eq.s32.totalorder %s30_s22, 0 }
   0xa   : > { %s3362_s24 = scalar_select %p33_p4, %s3279_s16, %s35_s23  }
   0xe   : > { %177 = sbr.rel (!%p3354_p3) target bundleno = 29 (0x1d), region = 28  ;;  %s179_s25 = sand.u32 (%p3354_p3), 1, %s3279_s16  }
   0xf   : > { %s3106_s26 = smul.u32 (%p3354_p3), 304, %s3287_s18 }
  0x10   : > { %s3105_s27 = smul.u32 (%p3354_p3), 152, %s179_s25 }
  0x11   : > { %s3372_s30 = scalar_lea.vmem (%p3354_p3), %s4515_s0, %s3106_s26 }
  0x12   : > { %v202_v0 = vld [vmem:[%s3372_s30] sm:$0xff] (%p3354_p3)   ;;  %v206_v1 = vld [vmem:[%s3372_s30 + $0x10] sm:$0xff] (%p3354_p3)   ;;  %s3377_s5 = scalar_lea.vmem (%p3354_p3), [#allocation5], %s3105_s27 }
  0x13   : > { %v210_v2 = vld [vmem:[%s3372_s30 + $0x20] sm:$0xff] (%p3354_p3)   ;;  %203 = vst [vmem:[%s3377_s5] sm:$0xff] (%p3354_p3), %v202_v0   ;;  %207 = vst [vmem:[%s3377_s5 + $0x8] sm:$0xff] (%p3354_p3), %v206_v1   ;;  %v214_v3 = vld [vmem:[%s3372_s30 + $0x30] sm:$0xff] (%p3354_p3)  }
  0x14   : > { %211 = vst [vmem:[%s3377_s5 + $0x10] sm:$0xff] (%p3354_p3), %v210_v2   ;;  %v218_v4 = vld [vmem:[%s3372_s30 + $0x40] sm:$0xff] (%p3354_p3)   ;;  %v222_v5 = vld [vmem:[%s3372_s30 + $0x50] sm:$0xff] (%p3354_p3)   ;;  %215 = vst [vmem:[%s3377_s5 + $0x18] sm:$0xff] (%p3354_p3), %v214_v3  }
  0x15   : > { %219 = vst [vmem:[%s3377_s5 + $0x20] sm:$0xff] %v218_v4   ;;  %223 = vst [vmem:[%s3377_s5 + $0x28] sm:$0xff] %v222_v5   ;;  %v226_v6 = vld [vmem:[%s3372_s30 + $0x60] sm:$0xff]   ;;  %v230_v7 = vld [vmem:[%s3372_s30 + $0x70] sm:$0xff]  }
  0x16   : > { %v234_v8 = vld [vmem:[%s3372_s30 + $0x80] sm:$0xff]   ;;  %227 = vst [vmem:[%s3377_s5 + $0x30] sm:$0xff] %v226_v6   ;;  %231 = vst [vmem:[%s3377_s5 + $0x38] sm:$0xff] %v230_v7   ;;  %v238_v9 = vld [vmem:[%s3372_s30 + $0x90] sm:$0xff]  }
  0x17   : > { %235 = vst [vmem:[%s3377_s5 + $0x40] sm:$0xff] %v234_v8   ;;  %v242_v10 = vld [vmem:[%s3372_s30 + $0xa0] sm:$0xff]   ;;  %v246_v11 = vld [vmem:[%s3372_s30 + $0xb0] sm:$0xff]   ;;  %239 = vst [vmem:[%s3377_s5 + $0x48] sm:$0xff] %v238_v9  }
  0x18   : > { %243 = vst [vmem:[%s3377_s5 + $0x50] sm:$0xff] %v242_v10   ;;  %247 = vst [vmem:[%s3377_s5 + $0x58] sm:$0xff] %v246_v11   ;;  %v250_v12 = vld [vmem:[%s3372_s30 + $0xc0] sm:$0xff]   ;;  %v254_v13 = vld [vmem:[%s3372_s30 + $0xd0] sm:$0xff]  }
  0x19   : > { %v258_v14 = vld [vmem:[%s3372_s30 + $0xe0] sm:$0xff]   ;;  %251 = vst [vmem:[%s3377_s5 + $0x60] sm:$0xff] %v250_v12   ;;  %255 = vst [vmem:[%s3377_s5 + $0x68] sm:$0xff] %v254_v13   ;;  %v262_v15 = vld [vmem:[%s3372_s30 + $0xf0] sm:$0xff]  }
  0x1a   : > { %259 = vst [vmem:[%s3377_s5 + $0x70] sm:$0xff] %v258_v14   ;;  %v266_v16 = vld [vmem:[%s3372_s30 + $0x100] sm:$0xff]   ;;  %v270_v17 = vld [vmem:[%s3372_s30 + $0x110] sm:$0xff]   ;;  %263 = vst [vmem:[%s3377_s5 + $0x78] sm:$0xff] %v262_v15  }
  0x1b   : > { %267 = vst [vmem:[%s3377_s5 + $0x80] sm:$0xff] %v266_v16   ;;  %271 = vst [vmem:[%s3377_s5 + $0x88] sm:$0xff] %v270_v17   ;;  %v274_v18 = vld [vmem:[%s3372_s30 + $0x120] sm:$0xff]  }
  0x1c   : > { %275 = vst [vmem:[%s3377_s5 + $0x90] sm:$0xff] %v274_v18  }
  0x1d PF: > { %376 = sbr.rel (!%p3354_p3) target bundleno = 44 (0x2c), region = 69  ;;  %s378_s6 = sand.u32 (%p3354_p3), 1, %s3279_s16  }
  0x1e   : > { %s2877_s7 = smul.u32 (%p3354_p3), 304, %s3287_s18 }
  0x1f   : > { %s3107_s8 = smul.u32 (%p3354_p3), 152, %s378_s6 }
  0x20   : > { %s3421_s11 = scalar_lea.vmem (%p3354_p3), %s4516_s1, %s2877_s7 }
  0x21   : > { %v2878_v19 = vld [vmem:[%s3421_s11 + $0x8] sm:$0xff] (%p3354_p3)   ;;  %v2880_v20 = vld [vmem:[%s3421_s11 + $0x18] sm:$0xff] (%p3354_p3)   ;;  %s3426_s12 = scalar_lea.vmem (%p3354_p3), [#allocation6], %s3107_s8 }
  0x22   : > { %v2882_v21 = vld [vmem:[%s3421_s11 + $0x28] sm:$0xff] (%p3354_p3)   ;;  %403 = vst [vmem:[%s3426_s12] sm:$0xff] (%p3354_p3), %v2878_v19   ;;  %407 = vst [vmem:[%s3426_s12 + $0x8] sm:$0xff] (%p3354_p3), %v2880_v20   ;;  %v2884_v22 = vld [vmem:[%s3421_s11 + $0x38] sm:$0xff] (%p3354_p3)  }
  0x23   : > { %411 = vst [vmem:[%s3426_s12 + $0x10] sm:$0xff] (%p3354_p3), %v2882_v21   ;;  %v2886_v23 = vld [vmem:[%s3421_s11 + $0x48] sm:$0xff] (%p3354_p3)   ;;  %v2888_v24 = vld [vmem:[%s3421_s11 + $0x58] sm:$0xff] (%p3354_p3)   ;;  %415 = vst [vmem:[%s3426_s12 + $0x18] sm:$0xff] (%p3354_p3), %v2884_v22  }
  0x24   : > { %419 = vst [vmem:[%s3426_s12 + $0x20] sm:$0xff] %v2886_v23   ;;  %423 = vst [vmem:[%s3426_s12 + $0x28] sm:$0xff] %v2888_v24   ;;  %v2890_v25 = vld [vmem:[%s3421_s11 + $0x68] sm:$0xff]   ;;  %v2892_v26 = vld [vmem:[%s3421_s11 + $0x78] sm:$0xff]  }
  0x25   : > { %v2894_v27 = vld [vmem:[%s3421_s11 + $0x88] sm:$0xff]   ;;  %427 = vst [vmem:[%s3426_s12 + $0x30] sm:$0xff] %v2890_v25   ;;  %431 = vst [vmem:[%s3426_s12 + $0x38] sm:$0xff] %v2892_v26   ;;  %v2896_v28 = vld [vmem:[%s3421_s11 + $0x98] sm:$0xff]  }
  0x26   : > { %435 = vst [vmem:[%s3426_s12 + $0x40] sm:$0xff] %v2894_v27   ;;  %v2898_v29 = vld [vmem:[%s3421_s11 + $0xa8] sm:$0xff]   ;;  %v2900_v30 = vld [vmem:[%s3421_s11 + $0xb8] sm:$0xff]   ;;  %439 = vst [vmem:[%s3426_s12 + $0x48] sm:$0xff] %v2896_v28  }
  0x27   : > { %443 = vst [vmem:[%s3426_s12 + $0x50] sm:$0xff] %v2898_v29   ;;  %447 = vst [vmem:[%s3426_s12 + $0x58] sm:$0xff] %v2900_v30   ;;  %v2902_v31 = vld [vmem:[%s3421_s11 + $0xc8] sm:$0xff]   ;;  %v2904_v32 = vld [vmem:[%s3421_s11 + $0xd8] sm:$0xff]  }
  0x28   : > { %v2906_v33 = vld [vmem:[%s3421_s11 + $0xe8] sm:$0xff]   ;;  %451 = vst [vmem:[%s3426_s12 + $0x60] sm:$0xff] %v2902_v31   ;;  %455 = vst [vmem:[%s3426_s12 + $0x68] sm:$0xff] %v2904_v32   ;;  %v2908_v34 = vld [vmem:[%s3421_s11 + $0xf8] sm:$0xff]  }
  0x29   : > { %459 = vst [vmem:[%s3426_s12 + $0x70] sm:$0xff] %v2906_v33   ;;  %v2910_v35 = vld [vmem:[%s3421_s11 + $0x108] sm:$0xff]   ;;  %v2912_v36 = vld [vmem:[%s3421_s11 + $0x118] sm:$0xff]   ;;  %463 = vst [vmem:[%s3426_s12 + $0x78] sm:$0xff] %v2908_v34  }
  0x2a   : > { %467 = vst [vmem:[%s3426_s12 + $0x80] sm:$0xff] %v2910_v35   ;;  %471 = vst [vmem:[%s3426_s12 + $0x88] sm:$0xff] %v2912_v36   ;;  %v2914_v37 = vld [vmem:[%s3421_s11 + $0x128] sm:$0xff]  }
  0x2b   : > { %475 = vst [vmem:[%s3426_s12 + $0x90] sm:$0xff] %v2914_v37  }
  0x2c PF: > { %p2916_p6 = scmp.ge.s32.totalorder %s3291_s19, 1  ;;  %p575_p7 = scmp.lt.s32.totalorder %s3291_s19, 3 }
  0x2e   : > { %p576_p8 = pnand %p2916_p6, %p575_p7 }
  0x2f   : > { %s582_s13 = sand.u32 (!%p576_p8), 1, %s3275_s15   ;;  %vm804_vm0 = vcmask (!%p576_p8), 130048   ;;  %s3293_s15 = smov (!%p576_p8), 32   ;;  %vm1014_vm1 = vcmask (!%p576_p8), 261248   ;;  %vm1015_vm2 = vsmask.f32 (!%p576_p8), 7424 }
  0x30   : > { %579 = sbr.rel (%p576_p8) target bundleno = 739 (0x2e3), region = 110  ;;  %s3294_s23 = smov (!%p576_p8), 16   ;;  %vm3851_vm3 = vmand (!%p576_p8), %vm1014_vm1, %vm1015_vm2  ;;  %vm1400_vm4 = vcmask (!%p576_p8), 391424   ;;  %vm1264_vm5 = vcmask (!%p576_p8), 261255   ;;  %vm1265_vm6 = vsmask.f32 (!%p576_p8), 7966 }
  0x31   : > { %s3108_s14 = smul.u32 (!%p576_p8), 152, %s582_s13  ;;  %s3295_s25 = smov (!%p576_p8), 48   ;;  %vm3883_vm7 = vmand (!%p576_p8), %vm1264_vm5, %vm1265_vm6  ;;  %vm1630_vm8 = vcmask (!%p576_p8), 522624   ;;  %vm1631_vm9 = vsmask.f32 (!%p576_p8), 6400  ;;  %vm1496_vm11 = vcmask (!%p576_p8), 392455  }
  0x32   : > { %vm3902_vm10 = vmand (!%p576_p8), %vm1630_vm8, %vm1631_vm9  ;;  %vm1842_vm12 = vcmask (!%p576_p8), 523654   ;;  %vm1843_vm13 = vsmask.f32 (!%p576_p8), 7962  ;;  %vm1918_vm15 = vcmask (!%p576_p8), 523264   ;;  %s3296_s26 = smov (!%p576_p8), 64   ;;  %vm2561_vm1 = vcmask (!%p576_p8), 1040384  }
  0x33   : > { %s3466_s21 = scalar_lea.vmem (!%p576_p8), [#allocation5], %s3108_s14  ;;  %s3469_s22 = scalar_lea.vmem (!%p576_p8), [#allocation6], %s3108_s14  ;;  %vm3954_vm14 = vmand (!%p576_p8), %vm1842_vm12, %vm1843_vm13  ;;  %vm2730_vm2 = vcmask (!%p576_p8), 1041408   ;;  %vm2745_vm5 = vcmask (!%p576_p8), 1044480   ;;  %vm2750_vm6 = vcmask (!%p576_p8), 1045504  }
  0x34   : > { %v3199_v38 = vld [vmem:[%s3466_s21 + $0x18] sm:$0xff] (!%p576_p8)   ;;  %v3475_v41 = vld [vmem:[%s3469_s22 + $0x18] ss:$0 sps:$4 sm:$0xff] (!%p576_p8)   ;;  %v3481_v45 = vld [vmem:[%s3466_s21 + $0x20] sm:$0xff] (!%p576_p8)   ;;  %p624_p9 = scmp.lt.s32.totalorder (!%p576_p8), %s3283_s17, 1 }
  0x35   : > { %v3472_v39 = vld [vmem:[%s3469_s22 + $0x8] ss:$0 sps:$4 sm:$0xff] (!%p576_p8)   ;;  %v1327_v40 = vrot.slane (!%p576_p8), %v3199_v38, 1  ;;  %v3202_v42 = vld [vmem:[%s3466_s21 + $0x8] sm:$0xff] (!%p576_p8)   ;;  %808 = vst.msk [vmem:[#allocation2 + $0x18] sm:$0xff] (!%p576_p8), %vm804_vm0, %v3199_v38  ;;  %v848_v44 = vshll.u32 (!%p576_p8), %v3199_v38, 16 }
  0x36   : > { %v1136_v43 = vshll.u32 (!%p576_p8), %v3472_v39, 16  ;;  %v1144_v46 = vshll.u32 (!%p576_p8), %v3475_v41, 16  ;;  %v1325_v47 = vrot.slane (!%p576_p8), %v3202_v42, 1  ;;  %806 = vst.msk [vmem:[#allocation2 + $0x8] sm:$0xff] (!%p576_p8), %vm804_vm0, %v3202_v42  ;;  %v3489_v49 = vld [vmem:[%s3466_s21 + $0x10] sm:$0xff] (!%p576_p8)   ;;  %809 = vst.msk [vmem:[#allocation2 + $0x20] sm:$0xff] (!%p576_p8), %vm804_vm0, %v3481_v45 }
  0x37   : > { %1349 = vrot.lane.b32.xlu1 %v1327_v40, %s3293_s15  ;;  %v846_v51 = vshrl.u32 %v3199_v38, 16  ;;  %v850_v52 = vrot.slane %v848_v44, 1  ;;  %v834_v53 = vshll.u32 %v3202_v42, 16  ;;  %v841_v54 = vshll.u32 %v3489_v49, 16  ;;  %v3497_v55 = vld [vmem:[%s3466_s21 + $0x28] sm:$0xff]   ;;  %807 = vst.msk [vmem:[#allocation2 + $0x10] sm:$0xff] %vm804_vm0, %v3489_v49 }
  0x38   : > { %v1138_v48 = vrot.slane %v1136_v43, 1  ;;  %v1146_v50 = vrot.slane %v1144_v46, 1  ;;  %v1328_v57 = vrot.slane %v3481_v45, 1  ;;  %v839_v58 = vshrl.u32 %v3489_v49, 16  ;;  %v3505_v59 = vld [vmem:[%s3466_s21 + $0x58] sm:$0xff]   ;;  %810 = vst.msk [vmem:[#allocation2 + $0x28] sm:$0xff] %vm804_vm0, %v3497_v55 }
  0x39   : > { %v843_v60 = vrot.slane %v841_v54, 1  ;;  %v851_v61 = vor.u32 %v850_v52, %v846_v51  ;;  %v832_v62 = vshrl.u32 %v3202_v42, 16  ;;  %v836_v63 = vrot.slane %v834_v53, 1  ;;  %v3514_v1 = vld [vmem:[%s3466_s21 + $0x48] sm:$0xff]   ;;  %816 = vst.msk [vmem:[#allocation2 + $0x58] sm:$0xff] %vm804_vm0, %v3505_v59  ;;  %v3519_v2 = vld [vmem:[%s3466_s21 + $0x30] sm:$0xff]  }
  0x3a   : > { %v3154_v56 = vpack.i.bf16 %v1138_v48, %v1146_v50  ;;  %v855_v0 = vshll.u32 %v3481_v45, 16  ;;  %v3525_v4 = vld [vmem:[%s3466_s21 + $0x38] sm:$0xff]   ;;  %814 = vst.msk [vmem:[#allocation2 + $0x48] sm:$0xff] %vm804_vm0, %v3514_v1  ;;  %811 = vst.msk [vmem:[#allocation2 + $0x30] sm:$0xff] %vm804_vm0, %v3519_v2  ;;  %v853_v6 = vshrl.u32 %v3481_v45, 16  ;;  %v3534_v8 = vld [vmem:[%s3466_s21 + $0x50] sm:$0xff]  }
  0x3b   : > { %1345 = vrot.lane.b32.xlu1 %v1325_v47, %s3293_s15  ;;  %v844_v3 = vor.u32 %v843_v60, %v839_v58  ;;  %v837_v5 = vor.u32 %v836_v63, %v832_v62  ;;  %812 = vst.msk [vmem:[#allocation2 + $0x38] sm:$0xff] %vm804_vm0, %v3525_v4  ;;  %v1326_v9 = vrot.slane %v3489_v49, 1  ;;  %v1519_v10 = vrot.slane %v832_v62, 1  ;;  %v3542_v13 = vld [vmem:[%s3466_s21 + $0x60] sm:$0xff]   ;;  %815 = vst.msk [vmem:[#allocation2 + $0x50] sm:$0xff] %vm804_vm0, %v3534_v8  ;;  %v3553_v18 = vld [vmem:[%s3466_s21 + $0x68] sm:$0xff]  }
  0x3c   : > { %3155 = vrot.lane.b32.xlu0 %v3154_v56, %s3294_s23  ;;  %v857_v7 = vrot.slane %v855_v0, 1  ;;  %v1520_v11 = vrot.slane %v834_v53, 2  ;;  %v862_v12 = vshll.u32 %v3497_v55, 16  ;;  %v1525_v15 = vrot.slane %v846_v51, 1  ;;  %v3548_v17 = vld [vmem:[%s3466_s21 + $0x40] sm:$0xff]   ;;  %817 = vst.msk [vmem:[#allocation2 + $0x60] sm:$0xff] %vm804_vm0, %v3542_v13 }
  0x3d   : > { %v1526_v16 = vrot.slane %v848_v44, 2  ;;  %v860_v20 = vshrl.u32 %v3497_v55, 16  ;;  %813 = vst.msk [vmem:[#allocation2 + $0x40] sm:$0xff] %vm804_vm0, %v3548_v17  ;;  %v3562_v22 = vld [vmem:[%s3469_s22 + $0x20] ss:$0 sps:$4 sm:$0xff]   ;;  %818 = vst.msk [vmem:[#allocation2 + $0x68] sm:$0xff] %vm804_vm0, %v3553_v18 }
  0x3e   : > { %v858_v14 = vor.u32 %v857_v7, %v853_v6  ;;  %v1521_v19 = vor.u32 %v1520_v11, %v1519_v10  ;;  %v864_v21 = vrot.slane %v862_v12, 1  ;;  %v3568_v24 = vld [vmem:[%s3469_s22 + $0x10] ss:$0 sps:$4 sm:$0xff]   ;;  %v1423_v26 = vrot.slane %v3475_v41, 1  ;;  %v3593_v44 = vld [vmem:[%s3466_s21 + $0x70] sm:$0xff]   ;;  %v3625_v62 = vld [vmem:[%s3466_s21 + $0x78] sm:$0xff]  }
  0x3f   : > { %1351 = vrot.lane.b32.xlu1 %v1328_v57, %s3293_s15  ;;  %v1527_v23 = vor.u32 %v1526_v16, %v1525_v15  ;;  %v1140_v27 = vshll.u32 %v3568_v24, 16  ;;  %v1148_v28 = vshll.u32 %v3562_v22, 16  ;;  %v1329_v29 = vrot.slane %v3497_v55, 1  ;;  %819 = vst.msk [vmem:[#allocation2 + $0x70] sm:$0xff] %vm804_vm0, %v3593_v44  ;;  %820 = vst.msk [vmem:[#allocation2 + $0x78] sm:$0xff] %vm804_vm0, %v3625_v62  ;;  %s4536_s17 = smov (!%p624_p9, %s3283_s17), 1 }
  0x40   : > { %963 = vrot.lane.b32.xlu0 %v851_v61, %s3294_s23  ;;  %v865_v25 = vor.u32 %v864_v21, %v860_v20  ;;  %v1705_v30 = vshrl.u32 %v3475_v41, 16  ;;  %v1421_v31 = vrot.slane %v3472_v39, 1  ;;  %v1424_v34 = vrot.slane %v3562_v22, 1  ;;  %v3617_v61 = vld [vmem:[%s3466_s21] sm:$0xff]  }
  0x41   : > { %v1142_v32 = vrot.slane %v1140_v27, 1  ;;  %v1150_v33 = vrot.slane %v1148_v28, 1  ;;  %v1708_v36 = vrot.slane %v1144_v46, 2  ;;  %v1695_v37 = vshrl.u32 %v3472_v39, 16  ;;  %v3600_v46 = vld [vmem:[%s3469_s22 + $0x30] ss:$0 sps:$4 sm:$0xff]  }
  0x42   : > { %v1707_v35 = vrot.slane %v1705_v30, 1  ;;  %v1528_v40 = vrot.slane %v853_v6, 1  ;;  %v1529_v42 = vrot.slane %v855_v0, 2  ;;  %v1698_v48 = vrot.slane %v1136_v43, 2  ;;  %805 = vst.msk [vmem:[#allocation2] sm:$0xff] %vm804_vm0, %v3617_v61  ;;  %v3657_v21 = vld [vmem:[%s3466_s21 + $0x80] sm:$0xff]  }
  0x43   : > { %961 = vrot.lane.b32.xlu1 %v844_v3, %s3294_s23  ;;  %v3159_v38 = vpack.i.bf16 %v1142_v32, %v1150_v33  ;;  %v1697_v47 = vrot.slane %v1695_v37, 1  ;;  %v904_v41 = vshll.u32 %v3505_v59, 16  ;;  %v1522_v51 = vrot.slane %v839_v58, 1  ;;  %821 = vst.msk [vmem:[#allocation2 + $0x80] sm:$0xff] %vm804_vm0, %v3657_v21  ;;  %v3686_v37 = vld [vmem:[%s3466_s21 + $0x90] sm:$0xff]  }
  0x44   : > { %959 = vrot.lane.b32.xlu0 %v837_v5, %s3294_s23  ;;  %v1709_v45 = vor.u32 %v1708_v36, %v1707_v35  ;;  %v1530_v50 = vor.u32 %v1529_v42, %v1528_v40  ;;  %v1523_v39 = vrot.slane %v841_v54, 2  ;;  %v902_v52 = vshrl.u32 %v3505_v59, 16  ;;  %v3621_v54 = vld [vmem:[%s3469_s22 + $0x28] ss:$0 sps:$4 sm:$0xff]   ;;  %823 = vst.msk [vmem:[#allocation2 + $0x90] sm:$0xff] %vm804_vm0, %v3686_v37 }
  0x45   : > { %v1699_v43 = vor.u32 %v1698_v48, %v1697_v47  ;;  %v906_v53 = vrot.slane %v904_v41, 1  ;;  %v890_v56 = vshll.u32 %v3514_v1, 16  ;;  %v869_v57 = vshll.u32 %v3519_v2, 16 }
  0x46   : > { %v1156_v60 = vshll.u32 %v3600_v46, 16  ;;  %v1524_v49 = vor.u32 %v1523_v39, %v1522_v51  ;;  %v1720_v58 = vshrl.u32 %v3600_v46, 16  ;;  %v888_v3 = vshrl.u32 %v3514_v1, 16 }
  0x47   : > { %1347 = vrot.lane.b32.xlu1 %v1326_v9, %s3293_s15  ;;  %v907_v0 = vor.u32 %v906_v53, %v902_v52  ;;  %v892_v5 = vrot.slane %v890_v56, 1  ;;  %v1422_v7 = vrot.slane %v3568_v24, 1  ;;  %v867_v9 = vshrl.u32 %v3519_v2, 16  ;;  %v3709_v53 = vld [vmem:[%s3469_s22 + $0x58] ss:$0 sps:$4 sm:$0xff]  }
  0x48   : > { %965 = vrot.lane.b32.xlu0 %v858_v14, %s3294_s23  ;;  %v3627_v63 = vrot.slane %v1156_v60, 2  ;;  %v3637_v6 = vrot.slane %v1720_v58, 1  ;;  %v871_v10 = vrot.slane %v869_v57, 1  ;;  %v1152_v11 = vshll.u32 %v3621_v54, 16 }
  0x49   : > { %v893_v15 = vor.u32 %v892_v5, %v888_v3  ;;  %v1531_v16 = vrot.slane %v860_v20, 1  ;;  %v1425_v20 = vrot.slane %v3621_v54, 1  ;;  %v876_v30 = vshll.u32 %v3525_v4, 16 }
  0x4a   : > { %v1724_v14 = vor.u32 %v3627_v63, %v3637_v6  ;;  %v1710_v32 = vshrl.u32 %v3562_v22, 16  ;;  %v1333_v33 = vrot.slane %v3514_v1, 1  ;;  %v897_v36 = vshll.u32 %v3534_v8, 16  ;;  %v3704_v22 = vld [vmem:[%s3469_s22 + $0x48] ss:$0 sps:$4 sm:$0xff]  }
  0x4b   : > { %1575 = vrot.lane.b32.xlu1 %v1521_v19, %s3295_s25  ;;  %v1532_v19 = vrot.slane %v862_v12, 2  ;;  %v878_v35 = vrot.slane %v876_v30, 1  ;;  %v1713_v42 = vrot.slane %v1148_v28, 2  ;;  %v895_v48 = vshrl.u32 %v3534_v8, 16 }
  0x4c   : > { %1579 = vrot.lane.b32.xlu0 %v1527_v23, %s3295_s25  ;;  %v872_v23 = vor.u32 %v871_v10, %v867_v9  ;;  %v1712_v40 = vrot.slane %v1710_v32, 1  ;;  %v1703_v51 = vrot.slane %v1140_v27, 2  ;;  %v1331_v5 = vrot.slane %v3525_v4, 1 }
  0x4d   : > { %v1533_v55 = vor.u32 %v1532_v19, %v1531_v16  ;;  %v1336_v16 = vrot.slane %v3542_v13, 1  ;;  %v1549_v19 = vrot.slane %v902_v52, 1  ;;  %v1715_v52 = vshrl.u32 %v3621_v54, 16 }
  0x4e   : > { %v1714_v28 = vor.u32 %v1713_v42, %v1712_v40  ;;  %v1426_v32 = vrot.slane %v3600_v46, 1 }
  0x4f   : > { %967 = vrot.lane.b32.xlu1 %v865_v25, %s3294_s23  ;;  %v1154_v25 = vrot.slane %v1152_v11, 1 }
  0x50   : > { %1445 = vrot.lane.b32.xlu0 %v1423_v26, %s3293_s15  ;;  %v1158_v26 = vrot.slane %v1156_v60, 1 }
  0x52   : > { %v3164_v12 = vpack.i.bf16 %v1158_v26, %v1154_v25  ;;  %v1534_v26 = vrot.slane %v867_v9, 1  ;;  %v1543_v9 = vrot.slane %v888_v3, 1 }
  0x53   : > { %1353 = vrot.lane.b32.xlu1 %v1329_v29, %s3293_s15  ;;  %v3667_v29 = vld [vmem:[%s3466_s21 + $0x88] sm:$0xff]  }
  0x54   : > { %1441 = vrot.lane.b32.xlu0 %v1421_v31, %s3293_s15  ;;  %822 = vst.msk [vmem:[#allocation2 + $0x88] sm:$0xff] %vm804_vm0, %v3667_v29  ;;  %v1330_v31 = vrot.slane %v3519_v2, 1  ;;  %v1544_v2 = vrot.slane %v890_v56, 2  ;;  %vm2016_vm0 = vcmask 1048064  }
  0x56   : > { %v1545_v3 = vor.u32 %v1544_v2, %v1543_v9 }
  0x57   : > { %1447 = vrot.lane.b32.xlu1 %v1424_v34, %s3293_s15  ;;  %v874_v34 = vshrl.u32 %v3525_v4, 16 }
  0x58   : > { %3160 = vrot.lane.b32.xlu0 %v3159_v38, %s3294_s23  ;;  %v1335_v38 = vrot.slane %v3505_v59, 1  ;;  %v3744_v59 = vld [vmem:[%s3469_s22 + $0x38] ss:$0 sps:$4 sm:$0xff]  }
  0x59   : > { %v879_v47 = vor.u32 %v878_v35, %v874_v34  ;;  %v1718_v35 = vrot.slane %v1152_v11, 2  ;;  %v1160_v56 = vshll.u32 %v3744_v59, 16  ;;  %v1427_v9 = vrot.slane %v3744_v59, 1 }
  0x5b   : > { %1791 = vrot.lane.b32.xlu1 %v1709_v45, %s3295_s25  ;;  %v1700_v45 = vshrl.u32 %v3568_v24, 16  ;;  %v1168_v24 = vshll.u32 %v3704_v22, 16  ;;  %v1162_v54 = vrot.slane %v1160_v56, 1 }
  0x5c   : > { %1581 = vrot.lane.b32.xlu0 %v1530_v50, %s3295_s25  ;;  %v899_v50 = vrot.slane %v897_v36, 1 }
  0x5d   : > { %v1702_v39 = vrot.slane %v1700_v45, 1  ;;  %v1170_v10 = vrot.slane %v1168_v24, 1  ;;  %v1431_v45 = vrot.slane %v3709_v53, 1  ;;  %v1738_v2 = vrot.slane %v1168_v24, 2 }
  0x5e   : > { %v900_v60 = vor.u32 %v899_v50, %v895_v48 }
  0x5f   : > { %1787 = vrot.lane.b32.xlu1 %v1699_v43, %s3295_s25  ;;  %v911_v43 = vshll.u32 %v3542_v13, 16  ;;  %v1704_v27 = vor.u32 %v1703_v51, %v1702_v39  ;;  %v1537_v51 = vrot.slane %v874_v34, 1  ;;  %v1429_v39 = vrot.slane %v3704_v22, 1 }
  0x60   : > { %1577 = vrot.lane.b32.xlu0 %v1524_v49, %s3295_s25  ;;  %v909_v49 = vshrl.u32 %v3542_v13, 16 }
  0x61   : > { %v913_v58 = vrot.slane %v911_v43, 1 }
  0x63   : > { %979 = vrot.lane.b32.xlu1 %v907_v0, %s3294_s23  ;;  %v1176_v0 = vshll.u32 %v3709_v53, 16 }
  0x64   : > { %1443 = vrot.lane.b32.xlu0 %v1422_v7, %s3293_s15  ;;  %v914_v7 = vor.u32 %v913_v58, %v909_v49  ;;  %v3788_v58 = vld [vmem:[%s3469_s22 + $0x40] ss:$0 sps:$4 sm:$0xff]  }
  0x67   : > { %975 = vrot.lane.b32.xlu1 %v893_v15, %s3294_s23  ;;  %v1178_v15 = vrot.slane %v1176_v0, 1 }
  0x68   : > { %969 = vrot.lane.b32.xlu0 %v872_v23, %s3294_s23  ;;  %v1550_v23 = vrot.slane %v904_v41, 2  ;;  %v1334_v41 = vrot.slane %v3534_v8, 1 }
  0x69   : > { %v3169_v25 = vpack.i.bf16 %v1170_v10, %v1178_v15  ;;  %v1337_v10 = vrot.slane %v3553_v18, 1  ;;  %v1552_v15 = vrot.slane %v909_v49, 1 }
  0x6b   : > { %1583 = vrot.lane.b32.xlu1 %v1533_v55, %s3295_s25  ;;  %v1535_v55 = vrot.slane %v869_v57, 2  ;;  %v883_v57 = vshll.u32 %v3548_v17, 16 }
  0x6c   : > { %3165 = vrot.lane.b32.xlu0 %v3164_v12, %s3294_s23  ;;  %v1551_v12 = vor.u32 %v1550_v23, %v1549_v19  ;;  %v1332_v19 = vrot.slane %v3548_v17, 1 }
  0x6d   : > { %v885_v1 = vrot.slane %v883_v57, 1 }
  0x6f   : > { %1449 = vrot.lane.b32.xlu1 %v1425_v20, %s3293_s15  ;;  %v1536_v20 = vor.u32 %v1535_v55, %v1534_v26  ;;  %v1745_v55 = vshrl.u32 %v3709_v53, 16 }
  0x70   : > { %1355 = vrot.lane.b32.xlu0 %v1330_v31, %s3293_s15  ;;  %v3754_v31 = vld [vmem:[%s3469_s22 + $0x60] ss:$0 sps:$4 sm:$0xff]  }
  0x71   : > { %v1180_v40 = vshll.u32 %v3754_v31, 16  ;;  %v1432_v49 = vrot.slane %v3754_v31, 1 }
  0x73   : > { %1361 = vrot.lane.b32.xlu1 %v1333_v33, %s3293_s15  ;;  %v1717_v33 = vrot.slane %v1715_v52, 1  ;;  %v1182_v11 = vrot.slane %v1180_v40, 1  ;;  %v1735_v52 = vshrl.u32 %v3704_v22, 16 }
  0x74   : > { %1365 = vrot.lane.b32.xlu0 %v1335_v38, %s3293_s15  ;;  %v881_v38 = vshrl.u32 %v3548_v17, 16 }
  0x75   : > { %v1719_v42 = vor.u32 %v1718_v35, %v1717_v33  ;;  %v3174_v50 = vpack.i.bf16 %v1182_v11, %v1162_v54  ;;  %v1737_v33 = vrot.slane %v1735_v52, 1 }
  0x76   : > { %v886_v46 = vor.u32 %v885_v1, %v881_v38  ;;  %v1547_v1 = vrot.slane %v897_v36, 2 }
  0x77   : > { %971 = vrot.lane.b32.xlu1 %v879_v47, %s3294_s23  ;;  %v918_v47 = vshll.u32 %v3553_v18, 16  ;;  %v1739_v22 = vor.u32 %v1738_v2, %v1737_v33  ;;  %v827_v2 = vshll.u32 %v3617_v61, 16 }
  0x78   : > { %1793 = vrot.lane.b32.xlu0 %v1714_v28, %s3295_s25  ;;  %v1538_v28 = vrot.slane %v876_v30, 2  ;;  %v1164_v30 = vshll.u32 %v3788_v58, 16 }
  0x7a   : > { %v1166_v23 = vrot.slane %v1164_v30, 1 }
  0x7b   : > { %977 = vrot.lane.b32.xlu1 %v900_v60, %s3294_s23  ;;  %v916_v60 = vshrl.u32 %v3553_v18, 16 }
  0x7c   : > { %1789 = vrot.lane.b32.xlu0 %v1704_v27, %s3295_s25  ;;  %v920_v27 = vrot.slane %v918_v47, 1 }
  0x7e   : > { %v921_v4 = vor.u32 %v920_v27, %v916_v60  ;;  %v1555_v27 = vrot.slane %v916_v60, 1  ;;  %v1541_v60 = vrot.slane %v883_v57, 2  ;;  %v1029_v57 = vld [vmem:[#allocation2 + $0x20] sm:$0xff] }
  0x7f   : > { %1357 = vrot.lane.b32.xlu1 %v1331_v5, %s3293_s15  ;;  %v3791_v5 = vld [vmem:[%s3469_s22 + $0x50] ss:$0 sps:$4 sm:$0xff]  }
  0x80   : > { %981 = vrot.lane.b32.xlu0 %v914_v7, %s3294_s23  ;;  %v1539_v7 = vor.u32 %v1538_v28, %v1537_v51  ;;  %v1172_v34 = vshll.u32 %v3791_v5, 16  ;;  %v1430_v6 = vrot.slane %v3791_v5, 1  ;;  %v1023_v28 = vld [vmem:[#allocation2 + $0x10] sm:$0xff] }
  0x83   : > { %1367 = vrot.lane.b32.xlu1 %v1336_v16, %s3293_s15  ;;  %v1553_v16 = vrot.slane %v911_v43, 2  ;;  %v3815_v43 = vld [vmem:[%s3469_s22 + $0x68] ss:$0 sps:$4 sm:$0xff]  }
  0x84   : > { %3170 = vrot.lane.b32.xlu0 %v3169_v25, %s3294_s23  ;;  %v1174_v25 = vrot.slane %v1172_v34, 1  ;;  %v1184_v35 = vshll.u32 %v3815_v43, 16 }
  0x85   : > { %v1554_v26 = vor.u32 %v1553_v16, %v1552_v15  ;;  %v1020_v15 = vld [vmem:[#allocation2 + $0x8] sm:$0xff] }
  0x86   : > { %v3179_v13 = vpack.i.bf16 %v1166_v23, %v1174_v25  ;;  %v1186_v24 = vrot.slane %v1184_v35, 1  ;;  %v1740_v25 = vshrl.u32 %v3791_v5, 16 }
  0x87   : > { %1595 = vrot.lane.b32.xlu1 %v1551_v12, %s3295_s25  ;;  %v1747_v12 = vrot.slane %v1745_v55, 1  ;;  %v1725_v55 = vshrl.u32 %v3744_v59, 16 }
  0x88   : > { %1585 = vrot.lane.b32.xlu0 %v1536_v20, %s3295_s25  ;;  %v1748_v20 = vrot.slane %v1176_v0, 2  ;;  %v1742_v52 = vrot.slane %v1740_v25, 1  ;;  %v3946_v25 = vld [vmem:[%s3469_s22 + $0x78] ss:$0 sps:$4 sm:$0xff]  }
  0x8b   : > { %1363 = vrot.lane.b32.xlu1 %v1334_v41, %s3293_s15  ;;  %v3823_v41 = vld [vmem:[%s3469_s22 + $0x70] ss:$0 sps:$4 sm:$0xff]  }
  0x8c   : > { %1451 = vrot.lane.b32.xlu0 %v1426_v32, %s3293_s15  ;;  %v1749_v32 = vor.u32 %v1748_v20, %v1747_v12  ;;  %v1188_v53 = vshll.u32 %v3823_v41, 16 }
  0x8f   : > { %1591 = vrot.lane.b32.xlu1 %v1545_v3, %s3295_s25  ;;  %v1546_v3 = vrot.slane %v895_v48, 1  ;;  %v925_v48 = vshll.u32 %v3593_v44, 16 }
  0x90   : > { %1795 = vrot.lane.b32.xlu0 %v1719_v42, %s3295_s25  ;;  %v1190_v42 = vrot.slane %v1188_v53, 1 }
  0x91   : > { %v1548_v54 = vor.u32 %v1547_v1, %v1546_v3 }
  0x92   : > { %v3184_v36 = vpack.i.bf16 %v1190_v42, %v1186_v24  ;;  %v1750_v24 = vshrl.u32 %v3754_v31, 16 }
  0x93   : > { %973 = vrot.lane.b32.xlu1 %v886_v46, %s3294_s23 }
  0x94   : > { %1461 = vrot.lane.b32.xlu0 %v1431_v45, %s3293_s15  ;;  %v1026_v45 = vld [vmem:[#allocation2 + $0x18] sm:$0xff] }
  0x97   : > { %3175 = vrot.lane.b32.xlu1 %v3174_v50, %s3294_s23  ;;  %v927_v50 = vrot.slane %v925_v48, 1 }
  0x98   : > { %1457 = vrot.lane.b32.xlu0 %v1429_v39, %s3293_s15  ;;  %v1338_v39 = vrot.slane %v3593_v44, 1 }
  0x9b   : > { %1587 = vrot.lane.b32.xlu1 %v1539_v7, %s3295_s25  ;;  %v1556_v7 = vrot.slane %v918_v47, 2 }
  0x9c   : > { %983 = vrot.lane.b32.xlu0 %v921_v4, %s3294_s23 }
  0x9d   : > { %v1557_v23 = vor.u32 %v1556_v7, %v1555_v27  ;;  %v1752_v27 = vrot.slane %v1750_v24, 1  ;;  %v932_v7 = vshll.u32 %v3625_v62, 16 }
  0x9f   : > { %1369 = vrot.lane.b32.xlu1 %v1337_v10, %s3293_s15 }
  0xa0   : > { %1359 = vrot.lane.b32.xlu0 %v1332_v19, %s3293_s15  ;;  %v1540_v19 = vrot.slane %v881_v38, 1 }
  0xa3   : > { %1597 = vrot.lane.b32.xlu1 %v1554_v26, %s3295_s25  ;;  %v1542_v26 = vor.u32 %v1541_v60, %v1540_v19 }
  0xa4   : > { %3180 = vrot.lane.b32.xlu0 %v3179_v13, %s3294_s23 }
  0xa7   : > { %1463 = vrot.lane.b32.xlu1 %v1432_v49, %s3293_s15  ;;  %v1433_v49 = vrot.slane %v3815_v43, 1 }
  0xa8   : > { %1453 = vrot.lane.b32.xlu0 %v1427_v9, %s3293_s15  ;;  %v1743_v9 = vrot.slane %v1172_v34, 2  ;;  %v1727_v34 = vrot.slane %v1725_v55, 1  ;;  %v1324_v55 = vrot.slane %v3617_v61, 1 }
  0xa9   : > { %v1350_v0 = vpop.permute.xlu1 %1349 }
  0xab   : > { %1807 = vrot.lane.b32.xlu1 %v1749_v32, %s3295_s25 }
  0xac   : > { %1797 = vrot.lane.b32.xlu0 %v1724_v14, %s3295_s25  ;;  %v923_v14 = vshrl.u32 %v3593_v44, 16  ;;  %v1755_v44 = vshrl.u32 %v3815_v43, 16 }
  0xad   : > { %v1346_v46 = vpop.permute.xlu1 %1345 }
  0xae   : > { %v3847_v8 = vpop.permute.xlu0 %3155  ;;  %v928_v16 = vor.u32 %v927_v50, %v923_v14  ;;  %v829_v50 = vrot.slane %v827_v2, 1 }
  0xaf   : > { %1803 = vrot.lane.b32.xlu1 %v1739_v22, %s3295_s25  ;;  %v3157_v12 = vunpack.i.l.bf16 %v3847_v8  ;;  %v1728_v22 = vrot.slane %v1160_v56, 2  ;;  %v3158_v42 = vunpack.i.h.bf16 %v3847_v8 }
  0xb0   : > { %1593 = vrot.lane.b32.xlu0 %v1548_v54, %s3295_s25 }
  0xb1   : > { %v1352_v63 = vpop.permute.xlu1 %1351 }
  0xb2   : > { %v964_v51 = vpop.permute.xlu0 %963 }
  0xb3   : > { %3185 = vrot.lane.b32.xlu1 %v3184_v36, %s3294_s23  ;;  %v1027_v4 = vsel %vm3851_vm3, %v964_v51, %v1026_v45  ;;  %v1032_v36 = vld [vmem:[#allocation2 + $0x28] sm:$0xff]  ;;  %v1744_v45 = vor.u32 %v1743_v9, %v1742_v52  ;;  %v1758_v52 = vrot.slane %v1184_v35, 2 }
  0xb4   : > { %1028 = vst [vmem:[#allocation2 + $0x18] sm:$0xff] %v1027_v4  ;;  %1459 = vrot.lane.b32.xlu0 %v1430_v6, %s3293_s15  ;;  %v825_v6 = vshrl.u32 %v3617_v61, 16 }
  0xb5   : > { %v962_v10 = vpop.permute.xlu1 %961  ;;  %1404 = vst.msk [vmem:[#allocation2 + $0x18] sm:$0x7f] %vm1400_vm4, %v1350_v0  ;;  %v1428_v0 = vrot.slane %v3788_v58, 1 }
  0xb6   : > { %v1024_v18 = vsel %vm3851_vm3, %v962_v10, %v1023_v28  ;;  %v960_v47 = vpop.permute.xlu0 %959  ;;  %v830_v10 = vor.u32 %v829_v50, %v825_v6 }
  0xb7   : > { %1025 = vst [vmem:[#allocation2 + $0x10] sm:$0xff] %v1024_v18  ;;  %1371 = vrot.lane.b32.xlu1 %v1338_v39, %s3293_s15  ;;  %v1021_v38 = vsel %vm3851_vm3, %v960_v47, %v1020_v15  ;;  %v1729_v39 = vor.u32 %v1728_v22, %v1727_v34  ;;  %v1558_v15 = vrot.slane %v923_v14, 1  ;;  %v930_v18 = vshrl.u32 %v3625_v62, 16 }
  0xb8   : > { %1022 = vst [vmem:[#allocation2 + $0x8] sm:$0xff] %v1021_v38  ;;  %985 = vrot.lane.b32.xlu0 %v928_v16, %s3294_s23  ;;  %v1559_v16 = vrot.slane %v925_v48, 2  ;;  %v934_v47 = vrot.slane %v932_v7, 1  ;;  %v3943_v48 = vld [vmem:[%s3469_s22] ss:$0 sps:$4 sm:$0xff]   ;;  %v1730_v38 = vshrl.u32 %v3788_v58, 16 }
  0xb9   : > { %v1348_v17 = vpop.permute.xlu1 %1347  ;;  %1402 = vst.msk [vmem:[#allocation2 + $0x8] sm:$0x7f] %vm1400_vm4, %v1346_v46  ;;  %v1132_v9 = vshll.u32 %v3943_v48, 16 }
  0xba   : > { %1403 = vst.msk [vmem:[#allocation2 + $0x10] sm:$0x7f] %vm1400_vm4, %v1348_v17  ;;  %v966_v20 = vpop.permute.xlu0 %965  ;;  %v1560_v14 = vor.u32 %v1559_v16, %v1558_v15  ;;  %v1434_v16 = vrot.slane %v3823_v41, 1 }
  0xbb   : > { %1599 = vrot.lane.b32.xlu1 %v1557_v23, %s3295_s25  ;;  %v1276_v32 = vld [vmem:[#allocation2 + $0x18] sm:$0x80]  ;;  %v1030_v33 = vsel %vm3851_vm3, %v966_v20, %v1029_v57  ;;  %v935_v57 = vor.u32 %v934_v47, %v930_v18  ;;  %v1757_v20 = vrot.slane %v1755_v44, 1  ;;  %v1517_v44 = vrot.slane %v827_v2, 2 }
  0xbc   : > { %v1277_v3 = vsel %vm3883_vm7, %v3157_v12, %v1276_v32  ;;  %1031 = vst [vmem:[#allocation2 + $0x20] sm:$0xff] %v1030_v33  ;;  %1589 = vrot.lane.b32.xlu0 %v1542_v26, %s3295_s25  ;;  %v1642_v46 = vld [vmem:[#allocation2 + $0x18] sm:$0x7f]  ;;  %v1339_v26 = vrot.slane %v3625_v62, 1  ;;  %v1192_v32 = vshll.u32 %v3946_v25, 16 }
  0xbd   : > { %v1576_v5 = vpop.permute.xlu1 %1575  ;;  %1278 = vst [vmem:[#allocation2 + $0x18] sm:$0x80] %v1277_v3  ;;  %1405 = vst.msk [vmem:[#allocation2 + $0x20] sm:$0x7f] %vm1400_vm4, %v1352_v63  ;;  %v1753_v63 = vrot.slane %v1180_v40, 2  ;;  %v1732_v3 = vrot.slane %v1730_v38, 1 }
  0xbe   : > { %v1580_v54 = vpop.permute.xlu0 %1579  ;;  %v4003_v38 = vld [vmem:[%s3469_s22 + $0x80] ss:$0 sps:$4 sm:$0xff]  }
  0xbf   : > { %1465 = vrot.lane.b32.xlu1 %v1433_v49, %s3293_s15  ;;  %v1270_v59 = vld [vmem:[#allocation2 + $0x8] sm:$0x80]  ;;  %v1643_v56 = vsel %vm3902_vm10, %v1580_v54, %v1642_v46  ;;  %v1754_v60 = vor.u32 %v1753_v63, %v1752_v27  ;;  %v1050_v27 = vld [vmem:[#allocation2 + $0x58] sm:$0xff] }
  0xc0   : > { %v1271_v8 = vsel %vm3883_vm7, %v3158_v42, %v1270_v59  ;;  %v1636_v51 = vld [vmem:[#allocation2 + $0x8] sm:$0x7f]  ;;  %1644 = vst [vmem:[#allocation2 + $0x18] sm:$0x7f] %v1643_v56  ;;  %1455 = vrot.lane.b32.xlu0 %v1428_v0, %s3293_s15  ;;  %v1273_v42 = vld [vmem:[#allocation2 + $0x10] sm:$0x80] }
  0xc1   : > { %v968_v28 = vpop.permute.xlu1 %967  ;;  %1272 = vst [vmem:[#allocation2 + $0x8] sm:$0x80] %v1271_v8  ;;  %v1637_v4 = vsel %vm3902_vm10, %v1576_v5, %v1636_v51  ;;  %v1733_v5 = vrot.slane %v1164_v30, 2  ;;  %v1759_v30 = vor.u32 %v1758_v52, %v1757_v20  ;;  %v939_v8 = vshll.u32 %v3657_v21, 16 }
  0xc2   : > { %v1033_v31 = vsel %vm3851_vm3, %v968_v28, %v1032_v36  ;;  %1638 = vst [vmem:[#allocation2 + $0x8] sm:$0x7f] %v1637_v4  ;;  %v1446_v40 = vpop.permute.xlu0 %1445  ;;  %v1134_v36 = vrot.slane %v1132_v9, 1  ;;  %v1639_v28 = vld [vmem:[#allocation2 + $0x10] sm:$0x7f]  ;;  %v1196_v20 = vshll.u32 %v4003_v38, 16 }
  0xc3   : > { %1034 = vst [vmem:[#allocation2 + $0x28] sm:$0xff] %v1033_v31  ;;  %1805 = vrot.lane.b32.xlu1 %v1744_v45, %s3295_s25  ;;  %1500 = vst.msk [vmem:[#allocation2 + $0x18] sm:$0x80] %vm1496_vm11, %v1446_v40  ;;  %v1279_v34 = vld [vmem:[#allocation2 + $0x20] sm:$0x80]  ;;  %v1194_v45 = vrot.slane %v1192_v32, 1  ;;  %v1734_v63 = vor.u32 %v1733_v5, %v1732_v3 }
  0xc4   : > { %1799 = vrot.lane.b32.xlu0 %v1729_v39, %s3295_s25  ;;  %v1645_v54 = vld [vmem:[#allocation2 + $0x20] sm:$0x7f]  ;;  %v1561_v31 = vrot.slane %v930_v18, 1  ;;  %v1562_v40 = vrot.slane %v932_v7, 2  ;;  %v1044_v7 = vld [vmem:[#allocation2 + $0x48] sm:$0xff]  ;;  %v1340_v5 = vrot.slane %v3657_v21, 1 }
  0xc5   : > { %v1354_v19 = vpop.permute.xlu1 %1353  ;;  %v3189_v4 = vpack.i.bf16 %v1134_v36, %v1194_v45  ;;  %v1435_v45 = vrot.slane %v3946_v25, 1 }
  0xc6   : > { %1406 = vst.msk [vmem:[#allocation2 + $0x28] sm:$0x7f] %vm1400_vm4, %v1354_v19  ;;  %v1442_v23 = vpop.permute.xlu0 %1441  ;;  %v937_v19 = vshrl.u32 %v3657_v21, 16 }
  0xc7   : > { %957 = vrot.lane.b32.xlu1 %v830_v10, %s3294_s23  ;;  %1498 = vst.msk [vmem:[#allocation2 + $0x8] sm:$0x80] %vm1496_vm11, %v1442_v23  ;;  %v1563_v23 = vor.u32 %v1562_v40, %v1561_v31  ;;  %v3240_v40 = vld [vmem:[%s4517_s2 + $0x8] sm:$0xff]  }
  0xc8   : > { %1809 = vrot.lane.b32.xlu0 %v1754_v60, %s3295_s25  ;;  %v941_v60 = vrot.slane %v939_v8, 1 }
  0xc9   : > { %v1448_v17 = vpop.permute.xlu1 %1447 }
  0xca   : > { %v3161_v49 = vpop.permute.xlu0 %3160  ;;  %v1854_v24 = vld [vmem:[#allocation2 + $0x18] sm:$0xc0] }
  0xcb   : > { %1601 = vrot.lane.b32.xlu1 %v1560_v14, %s3295_s25  ;;  %v3163_v33 = vunpack.i.h.bf16 %v3161_v49  ;;  %v3162_v0 = vunpack.i.l.bf16 %v3161_v49  ;;  %v1516_v14 = vrot.slane %v825_v6, 1  ;;  %v942_v6 = vor.u32 %v941_v60, %v937_v19  ;;  %v1038_v60 = vld [vmem:[#allocation2 + $0x38] sm:$0xff] }
  0xcc   : > { %987 = vrot.lane.b32.xlu0 %v935_v57, %s3294_s23 }
  0xcd   : > { %v1792_v22 = vpop.permute.xlu1 %1791  ;;  %v1280_v43 = vsel %vm3883_vm7, %v3162_v0, %v1279_v34  ;;  %v1274_v46 = vsel %vm3883_vm7, %v3163_v33, %v1273_v42  ;;  %v1518_v49 = vor.u32 %v1517_v44, %v1516_v14  ;;  %v1648_v0 = vld [vmem:[#allocation2 + $0x28] sm:$0x7f]  ;;  %v1760_v34 = vshrl.u32 %v3823_v41, 16  ;;  %v3241_v14 = vld [vmem:[%s4517_s2 + $0x50] sm:$0xff]  }
  0xce   : > { %v1855_v35 = vsel %vm3954_vm14, %v1792_v22, %v1854_v24  ;;  %1281 = vst [vmem:[#allocation2 + $0x20] sm:$0x80] %v1280_v43  ;;  %v1582_v58 = vpop.permute.xlu0 %1581  ;;  %1275 = vst [vmem:[#allocation2 + $0x10] sm:$0x80] %v1274_v46  ;;  %v1848_v56 = vld [vmem:[#allocation2 + $0x8] sm:$0xc0] }
  0xcf   : > { %1856 = vst [vmem:[#allocation2 + $0x18] sm:$0xc0] %v1855_v35  ;;  %1343 = vrot.lane.b32.xlu1 %v1324_v55, %s3293_s15  ;;  %1501 = vst.msk [vmem:[#allocation2 + $0x20] sm:$0x80] %vm1496_vm11, %v1448_v17  ;;  %v1646_v50 = vsel %vm3902_vm10, %v1582_v58, %v1645_v54  ;;  %v4006_v17 = vld [vmem:[%s3469_s22 + $0x88] ss:$0 sps:$4 sm:$0xff]  }
  0xd0   : > { %1647 = vst [vmem:[#allocation2 + $0x20] sm:$0x7f] %v1646_v50  ;;  %1373 = vrot.lane.b32.xlu0 %v1339_v26, %s3293_s15  ;;  %v1035_v26 = vld [vmem:[#allocation2 + $0x30] sm:$0xff]  ;;  %v1200_v52 = vshll.u32 %v4006_v17, 16  ;;  %v1420_v42 = vrot.slane %v3943_v48, 1  ;;  %v1198_v43 = vrot.slane %v1196_v20, 1 }
  0xd1   : > { %v1788_v59 = vpop.permute.xlu1 %1787  ;;  %v3237_v46 = vld [vmem:[%s4517_s2 + $0x40] sm:$0xff]   ;;  %v1762_v50 = vrot.slane %v1760_v34, 1  ;;  %v1765_v41 = vshrl.u32 %v3946_v25, 16  ;;  %v3242_v44 = vld [vmem:[%s4517_s2 + $0x10] sm:$0xff]  }
  0xd2   : > { %v1849_v51 = vsel %vm3954_vm14, %v1788_v59, %v1848_v56  ;;  %v1578_v39 = vpop.permute.xlu0 %1577  ;;  %v1202_v35 = vrot.slane %v1200_v52, 1  ;;  %v3238_v58 = vld [vmem:[%s4517_s2] sm:$0xff]   ;;  %v1763_v59 = vrot.slane %v1188_v53, 2  ;;  %v946_v56 = vshll.u32 %v3667_v29, 16  ;;  %2977 = vmatprep.subr.bf16.mxu0 %v3237_v46  ;;  %3089 = vmatprep.subr.bf16.mxu1 %v3237_v46  ;;  %v3239_v53 = vld [vmem:[%s4517_s2 + $0x48] sm:$0xff]  }
  0xd3   : > { %1850 = vst [vmem:[#allocation2 + $0x8] sm:$0xc0] %v1849_v51  ;;  %1811 = vrot.lane.b32.xlu1 %v1759_v30, %s3295_s25  ;;  %v1640_v10 = vsel %vm3902_vm10, %v1578_v39, %v1639_v28  ;;  %v1282_v30 = vld [vmem:[#allocation2 + $0x28] sm:$0x80]  ;;  %v1564_v51 = vrot.slane %v937_v19, 1  ;;  %2978 = vmatpush3.bf16.msra.mxu0 %v3238_v58 }
  0xd4   : > { %1641 = vst [vmem:[#allocation2 + $0x10] sm:$0x7f] %v1640_v10  ;;  %1801 = vrot.lane.b32.xlu0 %v1734_v63, %s3295_s25  ;;  %3097 = vmatpush3.bf16.msra.mxu1 %v3238_v58  ;;  %v1764_v10 = vor.u32 %v1763_v59, %v1762_v50  ;;  %v1568_v58 = vrot.slane %v946_v56, 2  ;;  %v3246_v50 = vld [vmem:[%s4517_s2 + $0x20] sm:$0xff]  }
  0xd5   : > { %v980_v15 = vpop.permute.xlu1 %979  ;;  %2979 = vmatprep.subr.bf16.mxu0 %v3239_v53  ;;  %3090 = vmatprep.subr.bf16.mxu1 %v3239_v53  ;;  %v3248_v53 = vld [vmem:[%s4517_s2 + $0x28] sm:$0xff]  }
  0xd6   : > { %v1051_v62 = vsel %vm3851_vm3, %v980_v15, %v1050_v27  ;;  %v3995_v18 = vld [vmem:[#allocation2 + $0x18] sm:$0xff]  ;;  %v1444_v47 = vpop.permute.xlu0 %1443  ;;  %v3194_v27 = vpack.i.bf16 %v1202_v35, %v1198_v43  ;;  %v944_v15 = vshrl.u32 %v3667_v29, 16 }
  0xd7   : > { %1052 = vst [vmem:[#allocation2 + $0x58] sm:$0xff] %v1051_v62  ;;  %3190 = vrot.lane.b32.xlu1 %v3189_v4, %s3294_s23  ;;  %2051 = vst.msk [vmem:[#allocation3 + $0x18] sm:$0xff] %vm1918_vm15, %v3995_v18  ;;  %v1565_v4 = vrot.slane %v939_v8, 2  ;;  %2980 = vmatpush3.bf16.msra.mxu0 %v3240_v40 }
  0xd8   : > { %1922 = vst.msk [vmem:[#allocation3 + $0x30] sm:$0xff] %vm1918_vm15, %v3995_v18  ;;  %1467 = vrot.lane.b32.xlu0 %v1434_v16, %s3293_s15  ;;  %v948_v16 = vrot.slane %v946_v56, 1  ;;  %3098 = vmatpush3.bf16.msra.mxu1 %v3240_v40  ;;  %v1436_v56 = vrot.slane %v4003_v38, 1 }
  0xd9   : > { %1499 = vst.msk [vmem:[#allocation2 + $0x10] sm:$0x80] %vm1496_vm11, %v1444_v47  ;;  %v976_v57 = vpop.permute.xlu1 %975  ;;  %v1566_v62 = vor.u32 %v1565_v4, %v1564_v51  ;;  %v1768_v47 = vrot.slane %v1192_v32, 2  ;;  %2981 = vmatprep.subr.bf16.mxu0 %v3241_v14  ;;  %3091 = vmatprep.subr.bf16.mxu1 %v3241_v14  ;;  %v1693_v51 = vrot.slane %v1132_v9, 2  ;;  %v1773_v4 = vrot.slane %v1196_v20, 2 }
  0xda   : > { %v1045_v61 = vsel %vm3851_vm3, %v976_v57, %v1044_v7  ;;  %v4016_v2 = vld [vmem:[#allocation2 + $0x8] sm:$0xff]  ;;  %v970_v55 = vpop.permute.xlu0 %969  ;;  %v1767_v7 = vrot.slane %v1765_v41, 1 }
  0xdb   : > { %1046 = vst [vmem:[#allocation2 + $0x48] sm:$0xff] %v1045_v61  ;;  %1603 = vrot.lane.b32.xlu1 %v1563_v23, %s3295_s25  ;;  %1920 = vst.msk [vmem:[#allocation3 + $0x10] sm:$0xff] %vm1918_vm15, %v4016_v2  ;;  %v1036_v33 = vsel %vm3851_vm3, %v970_v55, %v1035_v26  ;;  %v953_v23 = vshll.u32 %v3686_v37, 16  ;;  %v949_v26 = vor.u32 %v948_v16, %v944_v15  ;;  %2982 = vmatpush3.bf16.msra.mxu0 %v3242_v44  ;;  %v1047_v61 = vld [vmem:[#allocation2 + $0x50] sm:$0xff]  ;;  %v3247_v41 = vld [vmem:[%s4517_s2 + $0x68] sm:$0xff]  }
  0xdc   : > { %1037 = vst [vmem:[#allocation2 + $0x30] sm:$0xff] %v1036_v33  ;;  %989 = vrot.lane.b32.xlu0 %v942_v6, %s3294_s23  ;;  %v1857_v6 = vld [vmem:[#allocation2 + $0x20] sm:$0xc0]  ;;  %v1769_v55 = vor.u32 %v1768_v47, %v1767_v7  ;;  %3099 = vmatpush3.bf16.msra.mxu1 %v3242_v44 }
  0xdd   : > { %v1584_v3 = vpop.permute.xlu1 %1583  ;;  %v955_v33 = vrot.slane %v953_v23, 1 }
  0xde   : > { %v1649_v22 = vsel %vm3902_vm10, %v1584_v3, %v1648_v0  ;;  %v3166_v24 = vpop.permute.xlu0 %3165  ;;  %v3243_v0 = vld [vmem:[%s4517_s2 + $0x58] sm:$0xff]  }
  0xdf   : > { %1650 = vst [vmem:[#allocation2 + $0x28] sm:$0x7f] %v1649_v22  ;;  %1573 = vrot.lane.b32.xlu1 %v1518_v49, %s3295_s25  ;;  %v3167_v54 = vunpack.i.l.bf16 %v3166_v24  ;;  %v3168_v28 = vunpack.i.h.bf16 %v3166_v24  ;;  %v951_v49 = vshrl.u32 %v3686_v37, 16  ;;  %v1341_v22 = vrot.slane %v3667_v29, 1  ;;  %2983 = vmatprep.subr.bf16.mxu0 %v3243_v0  ;;  %v1053_v29 = vld [vmem:[#allocation2 + $0x60] sm:$0xff] }
  0xe0   : > { %1375 = vrot.lane.b32.xlu0 %v1340_v5, %s3293_s15  ;;  %v3244_v5 = vld [vmem:[%s4517_s2 + $0x18] sm:$0xff]   ;;  %v1690_v24 = vshrl.u32 %v3943_v48, 16  ;;  %3092 = vmatprep.subr.bf16.mxu1 %v3243_v0  ;;  %v1851_v35 = vld [vmem:[#allocation2 + $0x10] sm:$0xc0] }
  0xe1   : > { %v1450_v36 = vpop.permute.xlu1 %1449  ;;  %v1283_v63 = vsel %vm3883_vm7, %v3167_v54, %v1282_v30  ;;  %2984 = vmatpush3.bf16.msra.mxu0 %v3244_v5  ;;  %v956_v46 = vor.u32 %v955_v33, %v951_v49  ;;  %v1567_v54 = vrot.slane %v944_v15, 1  ;;  %v1770_v30 = vshrl.u32 %v4003_v38, 16  ;;  %3100 = vmatpush3.bf16.msra.mxu1 %v3244_v5  ;;  %v1300_v7 = vld [vmem:[#allocation2 + $0x58] sm:$0x80]  ;;  %v3236_v0 = vld [vmem:[%s3469_s22 + $0x90] ss:$0 sps:$4 sm:$0xff]  }
  0xe2   : > { %1284 = vst [vmem:[#allocation2 + $0x28] sm:$0x80] %v1283_v63  ;;  %v1356_v39 = vpop.permute.xlu0 %1355  ;;  %v1692_v63 = vrot.slane %v1690_v24, 1  ;;  %v1342_v15 = vrot.slane %v3686_v37, 1  ;;  %v1294_v47 = vld [vmem:[#allocation2 + $0x48] sm:$0x80] }
  0xe3   : > { %1439 = vrot.lane.b32.xlu1 %v1420_v42, %s3293_s15  ;;  %1502 = vst.msk [vmem:[#allocation2 + $0x28] sm:$0x80] %vm1496_vm11, %v1450_v36  ;;  %v1285_v31 = vld [vmem:[#allocation2 + $0x30] sm:$0x80]  ;;  %v3245_v36 = vld [vmem:[%s4517_s2 + $0x60] sm:$0xff]   ;;  %v3252_v33 = vld [vmem:[%s4517_s2 + $0x38] sm:$0xff]  }
  0xe4   : > { %1407 = vst.msk [vmem:[#allocation2 + $0x30] sm:$0x7f] %vm1400_vm4, %v1356_v39  ;;  %v1286_v21 = vsel %vm3883_vm7, %v3168_v28, %v1285_v31  ;;  %1469 = vrot.lane.b32.xlu0 %v1435_v45, %s3293_s15  ;;  %2985 = vmatprep.subr.bf16.mxu0 %v3245_v36  ;;  %v1569_v39 = vor.u32 %v1568_v58, %v1567_v54 }
  0xe5   : > { %v1362_v8 = vpop.permute.xlu1 %1361  ;;  %1287 = vst [vmem:[#allocation2 + $0x30] sm:$0x80] %v1286_v21  ;;  %2986 = vmatpush3.bf16.msra.mxu0 %v3246_v50  ;;  %3093 = vmatprep.subr.bf16.mxu1 %v3245_v36  ;;  %v1694_v38 = vor.u32 %v1693_v51, %v1692_v63  ;;  %v3249_v21 = vld [vmem:[%s4517_s2 + $0x70] sm:$0xff]  }
  0xe6   : > { %1410 = vst.msk [vmem:[#allocation2 + $0x48] sm:$0x7f] %vm1400_vm4, %v1362_v8  ;;  %v1366_v19 = vpop.permute.xlu0 %1365  ;;  %3101 = vmatpush3.bf16.msra.mxu1 %v3246_v50  ;;  %2987 = vmatprep.subr.bf16.mxu0 %v3247_v41 }
  0xe7   : > { %3195 = vrot.lane.b32.xlu1 %v3194_v27, %s3294_s23  ;;  %1412 = vst.msk [vmem:[#allocation2 + $0x58] sm:$0x7f] %vm1400_vm4, %v1366_v19  ;;  %v1772_v27 = vrot.slane %v1770_v30, 1  ;;  %3094 = vmatprep.subr.bf16.mxu1 %v3247_v41  ;;  %v3250_v19 = vld [vmem:[%s4517_s2 + $0x30] sm:$0xff]  }
  0xe8   : > { %1813 = vrot.lane.b32.xlu0 %v1764_v10, %s3295_s25 }
  0xe9   : > { %v972_v57 = vpop.permute.xlu1 %971  ;;  %2988 = vmatpush3.bf16.msra.mxu0 %v3248_v53  ;;  %v1774_v40 = vor.u32 %v1773_v4, %v1772_v27 }
  0xea   : > { %v1039_v25 = vsel %vm3851_vm3, %v972_v57, %v1038_v60  ;;  %v1794_v32 = vpop.permute.xlu0 %1793  ;;  %3102 = vmatpush3.bf16.msra.mxu1 %v3248_v53  ;;  %2989 = vmatprep.subr.bf16.mxu0 %v3249_v21  ;;  %v1860_v54 = vld [vmem:[#allocation2 + $0x28] sm:$0xc0] }
  0xeb   : > { %1040 = vst [vmem:[#allocation2 + $0x38] sm:$0xff] %v1039_v25  ;;  %1605 = vrot.lane.b32.xlu1 %v1566_v62, %s3295_s25  ;;  %v1858_v3 = vsel %vm3954_vm14, %v1794_v32, %v1857_v6  ;;  %3095 = vmatprep.subr.bf16.mxu1 %v3249_v21  ;;  %v1651_v25 = vld [vmem:[#allocation2 + $0x30] sm:$0x7f]  ;;  %v1571_v6 = vrot.slane %v953_v23, 2  ;;  %v1437_v23 = vrot.slane %v4006_v17, 1 }
  0xec   : > { %1859 = vst [vmem:[#allocation2 + $0x20] sm:$0xc0] %v1858_v3  ;;  %991 = vrot.lane.b32.xlu0 %v949_v26, %s3294_s23  ;;  %v1570_v26 = vrot.slane %v951_v49, 1 }
  0xed   : > { %v978_v34 = vpop.permute.xlu1 %977  ;;  %2990 = vmatpush3.bf16.msra.mxu0 %v3250_v19  ;;  %v1660_v24 = vld [vmem:[#allocation2 + $0x48] sm:$0x7f] }
  0xee   : > { %v1048_v42 = vsel %vm3851_vm3, %v978_v34, %v1047_v61  ;;  %v1790_v43 = vpop.permute.xlu0 %1789  ;;  %v1666_v62 = vld [vmem:[#allocation2 + $0x58] sm:$0x7f]  ;;  %v1775_v61 = vshrl.u32 %v4006_v17, 16  ;;  %3103 = vmatpush3.bf16.msra.mxu1 %v3250_v19  ;;  %v1572_v5 = vor.u32 %v1571_v6, %v1570_v26 }
  0xef   : > { %1049 = vst [vmem:[#allocation2 + $0x50] sm:$0xff] %v1048_v42  ;;  %1815 = vrot.lane.b32.xlu1 %v1769_v55, %s3295_s25  ;;  %v1852_v45 = vsel %vm3954_vm14, %v1790_v43, %v1851_v35  ;;  %v3251_v55 = vld [vmem:[%s4517_s2 + $0x78] sm:$0xff]   ;;  %v1204_v43 = vshll.u32 %v3236_v0, 16 }
  0xf0   : > { %1853 = vst [vmem:[#allocation2 + $0x10] sm:$0xc0] %v1852_v45  ;;  %1377 = vrot.lane.b32.xlu0 %v1341_v22, %s3293_s15  ;;  %2991 = vmatprep.subr.bf16.mxu0 %v3251_v55  ;;  %v1777_v34 = vrot.slane %v1775_v61, 1  ;;  %v1778_v22 = vrot.slane %v1200_v52, 2 }
  0xf1   : > { %v1358_v59 = vpop.permute.xlu1 %1357  ;;  %2992 = vmatpush3.bf16.msra.mxu0 %v3252_v33  ;;  %3096 = vmatprep.subr.bf16.mxu1 %v3251_v55  ;;  %v1206_v30 = vrot.slane %v1204_v43, 1 }
  0xf2   : > { %1408 = vst.msk [vmem:[#allocation2 + $0x38] sm:$0x7f] %vm1400_vm4, %v1358_v59  ;;  %v982_v28 = vpop.permute.xlu0 %981  ;;  %3104 = vmatpush3.bf16.msra.mxu1 %v3252_v33  ;;  %v1779_v58 = vor.u32 %v1778_v22, %v1777_v34  ;;  %v1438_v59 = vrot.slane %v3236_v0, 1  ;;  %v1288_v51 = vld [vmem:[#allocation2 + $0x38] sm:$0x80] }
  0xf3   : > { %993 = vrot.lane.b32.xlu1 %v956_v46, %s3294_s23  ;;  %v1054_v48 = vsel %vm3851_vm3, %v982_v28, %v1053_v29  ;;  %v4126_v9 = vld [vmem:[#allocation2 + $0x20] sm:$0xff]  ;;  %v1780_v29 = vshrl.u32 %v3236_v0, 16 }
  0xf4   : > { %1055 = vst [vmem:[#allocation2 + $0x60] sm:$0xff] %v1054_v48  ;;  %1471 = vrot.lane.b32.xlu0 %v1436_v56, %s3293_s15  ;;  %2052 = vst.msk [vmem:[#allocation3 + $0x28] sm:$0xff] %vm1918_vm15, %v4126_v9 }
  0xf5   : > { %v1368_v31 = vpop.permute.xlu1 %1367  ;;  %1923 = vst.msk [vmem:[#allocation3 + $0x40] sm:$0xff] %vm1918_vm15, %v4126_v9 }
  0xf6   : > { %1413 = vst.msk [vmem:[#allocation2 + $0x60] sm:$0x7f] %vm1400_vm4, %v1368_v31  ;;  %v3171_v20 = vpop.permute.xlu0 %3170  ;;  %v1056_v31 = vld [vmem:[#allocation2 + $0x68] sm:$0xff] }
  0xf7   : > { %1607 = vrot.lane.b32.xlu1 %v1569_v39, %s3295_s25  ;;  %v3173_v8 = vunpack.i.h.bf16 %v3171_v20  ;;  %v3172_v10 = vunpack.i.l.bf16 %v3171_v20  ;;  %v4142_v16 = vld [vmem:[#allocation2 + $0x10] sm:$0xff]  ;;  %v1783_v20 = vrot.slane %v1204_v43, 2 }
  0xf8   : > { %1785 = vrot.lane.b32.xlu0 %v1694_v38, %s3295_s25  ;;  %2050 = vst.msk [vmem:[#allocation3 + $0x8] sm:$0xff] %vm1918_vm15, %v4142_v16  ;;  %1921 = vst.msk [vmem:[#allocation3 + $0x20] sm:$0xff] %vm1918_vm15, %v4142_v16  ;;  %v1782_v38 = vrot.slane %v1780_v29, 1 }
  0xf9   : > { %v1596_v60 = vpop.permute.xlu1 %1595  ;;  %v1301_v44 = vsel %vm3883_vm7, %v3172_v10, %v1300_v7  ;;  %v1295_v57 = vsel %vm3883_vm7, %v3173_v8, %v1294_v47  ;;  %v1654_v48 = vld [vmem:[#allocation2 + $0x38] sm:$0x7f] }
  0xfa   : > { %v1667_v14 = vsel %vm3902_vm10, %v1596_v60, %v1666_v62  ;;  %v1586_v32 = vpop.permute.xlu0 %1585  ;;  %1302 = vst [vmem:[#allocation2 + $0x58] sm:$0x80] %v1301_v44  ;;  %1296 = vst [vmem:[#allocation2 + $0x48] sm:$0x80] %v1295_v57  ;;  %v1297_v57 = vld [vmem:[#allocation2 + $0x50] sm:$0x80] }
  0xfb   : > { %1668 = vst [vmem:[#allocation2 + $0x58] sm:$0x7f] %v1667_v14  ;;  %1817 = vrot.lane.b32.xlu1 %v1774_v40, %s3295_s25  ;;  %v1652_v49 = vsel %vm3902_vm10, %v1586_v32, %v1651_v25  ;;  %v1303_v28 = vld [vmem:[#allocation2 + $0x60] sm:$0x80] }
  0xfc   : > { %1653 = vst [vmem:[#allocation2 + $0x30] sm:$0x7f] %v1652_v49  ;;  %1379 = vrot.lane.b32.xlu0 %v1342_v15, %s3293_s15  ;;  %v1784_v15 = vor.u32 %v1783_v20, %v1782_v38  ;;  %v1017_v38 = vld [vmem:[#allocation2] sm:$0xff] }
  0xfd   : > { %v1364_v37 = vpop.permute.xlu1 %1363  ;;  %v1669_v60 = vld [vmem:[#allocation2 + $0x60] sm:$0x7f] }
  0xfe   : > { %1411 = vst.msk [vmem:[#allocation2 + $0x50] sm:$0x7f] %vm1400_vm4, %v1364_v37  ;;  %v1452_v3 = vpop.permute.xlu0 %1451 }
  0xff   : > { %1968 = vrot.lane.b32.xlu1 %v4016_v2, %s3296_s26  ;;  %1503 = vst.msk [vmem:[#allocation2 + $0x30] sm:$0x80] %vm1496_vm11, %v1452_v3  ;;  %v1041_v2 = vld [vmem:[#allocation2 + $0x40] sm:$0xff] }
 0x100   : > { %1473 = vrot.lane.b32.xlu0 %v1437_v23, %s3293_s15 }
 0x101   : > { %v1592_v42 = vpop.permute.xlu1 %1591 }
 0x102   : > { %v1661_v35 = vsel %vm3902_vm10, %v1592_v42, %v1660_v24  ;;  %v1796_v46 = vpop.permute.xlu0 %1795 }
 0x103   : > { %1662 = vst [vmem:[#allocation2 + $0x48] sm:$0x7f] %v1661_v35  ;;  %1609 = vrot.lane.b32.xlu1 %v1572_v5, %s3295_s25  ;;  %v1861_v17 = vsel %vm3954_vm14, %v1796_v46, %v1860_v54 }
 0x104   : > { %1862 = vst [vmem:[#allocation2 + $0x28] sm:$0xc0] %v1861_v17  ;;  %2099 = vrot.lane.b32.xlu0 %v3995_v18, %s3296_s26 }
 0x105   : > { %v974_v52 = vpop.permute.xlu1 %973  ;;  %v1663_v5 = vld [vmem:[#allocation2 + $0x50] sm:$0x7f] }
 0x106   : > { %v1042_v36 = vsel %vm3851_vm3, %v974_v52, %v1041_v2  ;;  %v1462_v45 = vpop.permute.xlu0 %1461  ;;  %v1863_v33 = vld [vmem:[#allocation2 + $0x30] sm:$0xc0] }
 0x107   : > { %1043 = vst [vmem:[#allocation2 + $0x40] sm:$0xff] %v1042_v36  ;;  %1819 = vrot.lane.b32.xlu1 %v1779_v58, %s3295_s25  ;;  %1508 = vst.msk [vmem:[#allocation2 + $0x58] sm:$0x80] %vm1496_vm11, %v1462_v45  ;;  %v1059_v58 = vld [vmem:[#allocation2 + $0x70] sm:$0xff] }
 0x108   : > { %1243 = vrot.lane.b32.xlu0 %v1206_v30, %s3294_s23  ;;  %s2976_s23 = sshll.u32 %s4536_s17, 5 }
 0x109   : > { %v3176_v50 = vpop.permute.xlu1 %3175  ;;  %s4449_s28 = scalar_lea.vmem %s4519_s4, %s2976_s23 }
 0x10a   : > { %v3178_v56 = vunpack.i.h.bf16 %v3176_v50  ;;  %v3177_v63 = vunpack.i.l.bf16 %v3176_v50  ;;  %v1458_v39 = vpop.permute.xlu0 %1457 }
 0x10b   : > { %1970 = vrot.lane.b32.xlu1 %v4142_v16, %s3296_s26  ;;  %1506 = vst.msk [vmem:[#allocation2 + $0x48] sm:$0x80] %vm1496_vm11, %v1458_v39  ;;  %v4201_v41 = vld [vmem:[#allocation2 + $0x28] sm:$0xff] }
 0x10c   : > { %v1289_v27 = vsel %vm3883_vm7, %v3177_v63, %v1288_v51  ;;  %v1304_v4 = vsel %vm3883_vm7, %v3178_v56, %v1303_v28  ;;  %1475 = vrot.lane.b32.xlu0 %v1438_v59, %s3293_s15  ;;  %2053 = vst.msk [vmem:[#allocation3 + $0x38] sm:$0xff] %vm1918_vm15, %v4201_v41  ;;  %1924 = vst.msk [vmem:[#allocation3 + $0x50] sm:$0xff] %vm1918_vm15, %v4201_v41 }
 0x10d   : > { %1290 = vst [vmem:[#allocation2 + $0x38] sm:$0x80] %v1289_v27  ;;  %1305 = vst [vmem:[#allocation2 + $0x60] sm:$0x80] %v1304_v4  ;;  %v1588_v53 = vpop.permute.xlu1 %1587 }
 0x10e   : > { %v1655_v40 = vsel %vm3902_vm10, %v1588_v53, %v1654_v48  ;;  %v984_v21 = vpop.permute.xlu0 %983  ;;  %v1291_v44 = vld [vmem:[#allocation2 + $0x40] sm:$0x80]  ;;  %v1878_v55 = vld [vmem:[#allocation2 + $0x58] sm:$0xc0] }
 0x10f   : > { %1656 = vst [vmem:[#allocation2 + $0x38] sm:$0x7f] %v1655_v40  ;;  %2103 = vrot.lane.b32.xlu1 %v4201_v41, %s3296_s26  ;;  %v1057_v8 = vsel %vm3851_vm3, %v984_v21, %v1056_v31 }
 0x110   : > { %1058 = vst [vmem:[#allocation2 + $0x68] sm:$0xff] %v1057_v8  ;;  %2101 = vrot.lane.b32.xlu0 %v4126_v9, %s3296_s26 }
 0x111   : > { %v1370_v10 = vpop.permute.xlu1 %1369 }
 0x112   : > { %1414 = vst.msk [vmem:[#allocation2 + $0x68] sm:$0x7f] %vm1400_vm4, %v1370_v10  ;;  %v1360_v16 = vpop.permute.xlu0 %1359  ;;  %v1872_v0 = vld [vmem:[#allocation2 + $0x48] sm:$0xc0] }
 0x113   : > { %1409 = vst.msk [vmem:[#allocation2 + $0x40] sm:$0x7f] %vm1400_vm4, %v1360_v16  ;;  %v1062_v16 = vld [vmem:[#allocation2 + $0x78] sm:$0xff] }
 0x114   : > { %1821 = vrot.lane.b32.xlu0 %v1784_v15, %s3295_s25 }
 0x115   : > { %v1598_v19 = vpop.permute.xlu1 %1597 }
 0x116   : > { %v1670_v62 = vsel %vm3902_vm10, %v1598_v19, %v1669_v60  ;;  %v3181_v7 = vpop.permute.xlu0 %3180 }
 0x117   : > { %1671 = vst [vmem:[#allocation2 + $0x60] sm:$0x7f] %v1670_v62  ;;  %v3183_v47 = vunpack.i.h.bf16 %v3181_v7  ;;  %v3182_v14 = vunpack.i.l.bf16 %v3181_v7  ;;  %v1306_v43 = vld [vmem:[#allocation2 + $0x68] sm:$0x80] }
 0x118   : > { %1972 = vrot.lane.b32.xlu0 %v3995_v18, %s3296_s26 }
 0x119   : > { %v1464_v26 = vpop.permute.xlu1 %1463  ;;  %v1292_v25 = vsel %vm3883_vm7, %v3183_v47, %v1291_v44  ;;  %v1298_v32 = vsel %vm3883_vm7, %v3182_v14, %v1297_v57  ;;  %v1672_v45 = vld [vmem:[#allocation2 + $0x68] sm:$0x7f] }
 0x11a   : > { %1509 = vst.msk [vmem:[#allocation2 + $0x60] sm:$0x80] %vm1496_vm11, %v1464_v26  ;;  %1293 = vst [vmem:[#allocation2 + $0x40] sm:$0x80] %v1292_v25  ;;  %v1454_v6 = vpop.permute.xlu0 %1453  ;;  %v1657_v59 = vld [vmem:[#allocation2 + $0x40] sm:$0x7f] }
 0x11b   : > { %1299 = vst [vmem:[#allocation2 + $0x50] sm:$0x80] %v1298_v32  ;;  %1504 = vst.msk [vmem:[#allocation2 + $0x38] sm:$0x80] %vm1496_vm11, %v1454_v6 }
 0x11c   : > { %1974 = vrot.lane.b32.xlu0 %v4126_v9, %s3296_s26 }
 0x11d   : > { %v1808_v61 = vpop.permute.xlu1 %1807 }
 0x11e   : > { %v1879_v18 = vsel %vm3954_vm14, %v1808_v61, %v1878_v55  ;;  %v1798_v49 = vpop.permute.xlu0 %1797 }
 0x11f   : > { %1880 = vst [vmem:[#allocation2 + $0x58] sm:$0xc0] %v1879_v18  ;;  %v1864_v37 = vsel %vm3954_vm14, %v1798_v49, %v1863_v33 }
 0x120   : > { %1865 = vst [vmem:[#allocation2 + $0x30] sm:$0xc0] %v1864_v37 }
 0x121   : > { %v1804_v23 = vpop.permute.xlu1 %1803  ;;  %v1881_v8 = vld [vmem:[#allocation2 + $0x60] sm:$0xc0] }
 0x122   : > { %v1873_v3 = vsel %vm3954_vm14, %v1804_v23, %v1872_v0  ;;  %v1594_v9 = vpop.permute.xlu0 %1593  ;;  %v1866_v53 = vld [vmem:[#allocation2 + $0x38] sm:$0xc0] }
 0x123   : > { %1874 = vst [vmem:[#allocation2 + $0x48] sm:$0xc0] %v1873_v3  ;;  %v1664_v34 = vsel %vm3902_vm10, %v1594_v9, %v1663_v5 }
 0x124   : > { %1665 = vst [vmem:[#allocation2 + $0x50] sm:$0x7f] %v1664_v34 }
 0x125   : > { %v3186_v22 = vpop.permute.xlu1 %3185 }
 0x126   : > { %v3187_v24 = vunpack.i.l.bf16 %v3186_v22  ;;  %v4239_v42 = vld [vmem:[#allocation2 + $0x58] sm:$0xff]  ;;  %v1460_v35 = vpop.permute.xlu0 %1459  ;;  %v3188_v51 = vunpack.i.h.bf16 %v3186_v22  ;;  %v1065_v22 = vld [vmem:[#allocation2 + $0x80] sm:$0xff] }
 0x127   : > { %2059 = vst.msk [vmem:[#allocation3 + $0x98] sm:$0xff] %vm1918_vm15, %v4239_v42  ;;  %1930 = vst.msk [vmem:[#allocation3 + $0xb0] sm:$0xff] %vm1918_vm15, %v4239_v42  ;;  %v4248_v54 = vld [vmem:[#allocation2 + $0x30] sm:$0xff] }
 0x128   : > { %v1307_v46 = vsel %vm3883_vm7, %v3187_v24, %v1306_v43  ;;  %1507 = vst.msk [vmem:[#allocation2 + $0x50] sm:$0x80] %vm1496_vm11, %v1460_v35  ;;  %2105 = vrot.lane.b32.xlu1 %v4248_v54, %s3296_s26 }
 0x129   : > { %1308 = vst [vmem:[#allocation2 + $0x68] sm:$0x80] %v1307_v46  ;;  %v1372_v2 = vpop.permute.xlu1 %1371  ;;  %2054 = vst.msk [vmem:[#allocation3 + $0x48] sm:$0xff] %vm1918_vm15, %v4248_v54 }
 0x12a   : > { %1925 = vst.msk [vmem:[#allocation3 + $0x60] sm:$0xff] %vm1918_vm15, %v4248_v54  ;;  %v4256_v17 = vld [vmem:[#allocation2 + $0x48] sm:$0xff]  ;;  %v986_v52 = vpop.permute.xlu0 %985 }
 0x12b   : > { %1984 = vrot.lane.b32.xlu0 %v4256_v17, %s3296_s26  ;;  %1928 = vst.msk [vmem:[#allocation3 + $0x90] sm:$0xff] %vm1918_vm15, %v4256_v17  ;;  %2057 = vst.msk [vmem:[#allocation3 + $0x78] sm:$0xff] %vm1918_vm15, %v4256_v17  ;;  %v1060_v30 = vsel %vm3851_vm3, %v986_v52, %v1059_v58 }
 0x12c   : > { %1061 = vst [vmem:[#allocation2 + $0x70] sm:$0xff] %v1060_v30  ;;  %2115 = vrot.lane.b32.xlu1 %v4239_v42, %s3296_s26 }
 0x12d   : > { %v1600_v36 = vpop.permute.xlu1 %1599  ;;  %1415 = vst.msk [vmem:[#allocation2 + $0x70] sm:$0x7f] %vm1400_vm4, %v1372_v2 }
 0x12e   : > { %v1673_v50 = vsel %vm3902_vm10, %v1600_v36, %v1672_v45  ;;  %v1590_v29 = vpop.permute.xlu0 %1589 }
 0x12f   : > { %1674 = vst [vmem:[#allocation2 + $0x68] sm:$0x7f] %v1673_v50  ;;  %1976 = vrot.lane.b32.xlu0 %v4201_v41, %s3296_s26  ;;  %v1658_v56 = vsel %vm3902_vm10, %v1590_v29, %v1657_v59  ;;  %v1875_v48 = vld [vmem:[#allocation2 + $0x50] sm:$0xc0] }
 0x130   : > { %1659 = vst [vmem:[#allocation2 + $0x40] sm:$0x7f] %v1658_v56 }
 0x131   : > { %v1466_v63 = vpop.permute.xlu1 %1465 }
 0x132   : > { %1510 = vst.msk [vmem:[#allocation2 + $0x68] sm:$0x80] %vm1496_vm11, %v1466_v63  ;;  %v1456_v28 = vpop.permute.xlu0 %1455 }
 0x133   : > { %v1309_v39 = vld [vmem:[#allocation2 + $0x70] sm:$0x80]  ;;  %1505 = vst.msk [vmem:[#allocation2 + $0x40] sm:$0x80] %vm1496_vm11, %v1456_v28 }
 0x134   : > { %v1310_v27 = vsel %vm3883_vm7, %v3188_v51, %v1309_v39  ;;  %v1675_v19 = vld [vmem:[#allocation2 + $0x70] sm:$0x7f] }
 0x135   : > { %v1806_v4 = vpop.permute.xlu1 %1805  ;;  %1311 = vst [vmem:[#allocation2 + $0x70] sm:$0x80] %v1310_v27  ;;  %v1068_v27 = vld [vmem:[#allocation2 + $0x88] sm:$0xff] }
 0x136   : > { %v1876_v41 = vsel %vm3954_vm14, %v1806_v4, %v1875_v48  ;;  %v1800_v31 = vpop.permute.xlu0 %1799 }
 0x137   : > { %1877 = vst [vmem:[#allocation2 + $0x50] sm:$0xc0] %v1876_v41  ;;  %v1867_v20 = vsel %vm3954_vm14, %v1800_v31, %v1866_v53 }
 0x138   : > { %1868 = vst [vmem:[#allocation2 + $0x38] sm:$0xc0] %v1867_v20 }
 0x139   : > { %v958_v40 = vpop.permute.xlu1 %957  ;;  %v1884_v32 = vld [vmem:[#allocation2 + $0x68] sm:$0xc0] }
 0x13a   : > { %v1018_v21 = vsel %vm3851_vm3, %v958_v40, %v1017_v38  ;;  %v1810_v10 = vpop.permute.xlu0 %1809  ;;  %v1869_v18 = vld [vmem:[#allocation2 + $0x40] sm:$0xc0] }
 0x13b   : > { %1019 = vst [vmem:[#allocation2] sm:$0xff] %v1018_v21  ;;  %v1882_v15 = vsel %vm3954_vm14, %v1810_v10, %v1881_v8  ;;  %v1071_v21 = vld [vmem:[#allocation2 + $0x90] sm:$0xff] }
 0x13c   : > { %1883 = vst [vmem:[#allocation2 + $0x60] sm:$0xc0] %v1882_v15 }
 0x13d   : > { %v1602_v60 = vpop.permute.xlu1 %1601 }
 0x13e   : > { %v1676_v62 = vsel %vm3902_vm10, %v1602_v60, %v1675_v19  ;;  %v4289_v7 = vld [vmem:[#allocation2 + $0x50] sm:$0xff]  ;;  %v988_v47 = vpop.permute.xlu0 %987 }
 0x13f   : > { %1677 = vst [vmem:[#allocation2 + $0x70] sm:$0x7f] %v1676_v62  ;;  %1986 = vrot.lane.b32.xlu0 %v4289_v7, %s3296_s26  ;;  %2058 = vst.msk [vmem:[#allocation3 + $0x88] sm:$0xff] %vm1918_vm15, %v4289_v7  ;;  %v1063_v14 = vsel %vm3851_vm3, %v988_v47, %v1062_v16  ;;  %v2071_v44 = vld [vmem:[#allocation2 + $0x38] sm:$0xff] }
 0x140   : > { %1929 = vst.msk [vmem:[#allocation3 + $0xa0] sm:$0xff] %vm1918_vm15, %v4289_v7  ;;  %1064 = vst [vmem:[#allocation2 + $0x78] sm:$0xff] %v1063_v14  ;;  %2107 = vrot.lane.b32.xlu1 %v2071_v44, %s3296_s26 }
 0x141   : > { %v1344_v57 = vpop.permute.xlu1 %1343  ;;  %2055 = vst.msk [vmem:[#allocation3 + $0x58] sm:$0xff] %vm1918_vm15, %v2071_v44  ;;  %1926 = vst.msk [vmem:[#allocation3 + $0x70] sm:$0xff] %vm1918_vm15, %v2071_v44 }
 0x142   : > { %1401 = vst.msk [vmem:[#allocation2] sm:$0x7f] %vm1400_vm4, %v1344_v57  ;;  %v1374_v26 = vpop.permute.xlu0 %1373  ;;  %v1267_v5 = vld [vmem:[#allocation2] sm:$0x80] }
 0x143   : > { %1978 = vrot.lane.b32.xlu0 %v4248_v54, %s3296_s26  ;;  %1416 = vst.msk [vmem:[#allocation2 + $0x78] sm:$0x7f] %vm1400_vm4, %v1374_v26  ;;  %v2076_v25 = vld [vmem:[#allocation2 + $0x60] sm:$0xff] }
 0x144   : > { %2117 = vrot.lane.b32.xlu1 %v2076_v25, %s3296_s26  ;;  %2060 = vst.msk [vmem:[#allocation3 + $0xa8] sm:$0xff] %vm1918_vm15, %v2076_v25  ;;  %1931 = vst.msk [vmem:[#allocation3 + $0xc0] sm:$0xff] %vm1918_vm15, %v2076_v25 }
 0x145   : > { %v1812_v6 = vpop.permute.xlu1 %1811 }
 0x146   : > { %v1885_v61 = vsel %vm3954_vm14, %v1812_v6, %v1884_v32  ;;  %v1802_v55 = vpop.permute.xlu0 %1801 }
 0x147   : > { %1886 = vst [vmem:[#allocation2 + $0x68] sm:$0xc0] %v1885_v61  ;;  %1988 = vrot.lane.b32.xlu0 %v4239_v42, %s3296_s26  ;;  %v1870_v49 = vsel %vm3954_vm14, %v1802_v55, %v1869_v18  ;;  %v1312_v3 = vld [vmem:[#allocation2 + $0x78] sm:$0x80] }
 0x148   : > { %1871 = vst [vmem:[#allocation2 + $0x40] sm:$0xc0] %v1870_v49 }
 0x149   : > { %v3191_v33 = vpop.permute.xlu1 %3190  ;;  %v1633_v52 = vld [vmem:[#allocation2] sm:$0x7f] }
 0x14a   : > { %v3193_v37 = vunpack.i.h.bf16 %v3191_v33  ;;  %v3192_v23 = vunpack.i.l.bf16 %v3191_v33  ;;  %v1468_v0 = vpop.permute.xlu0 %1467  ;;  %v1678_v24 = vld [vmem:[#allocation2 + $0x78] sm:$0x7f] }
 0x14b   : > { %1980 = vrot.lane.b32.xlu0 %v2071_v44, %s3296_s26  ;;  %1511 = vst.msk [vmem:[#allocation2 + $0x70] sm:$0x80] %vm1496_vm11, %v1468_v0 }
 0x14c   : > { %v1268_v9 = vsel %vm3883_vm7, %v3193_v37, %v1267_v5  ;;  %v1313_v34 = vsel %vm3883_vm7, %v3192_v23, %v1312_v3 }
 0x14d   : > { %1269 = vst [vmem:[#allocation2] sm:$0x80] %v1268_v9  ;;  %1314 = vst [vmem:[#allocation2 + $0x78] sm:$0x80] %v1313_v34  ;;  %v1604_v42 = vpop.permute.xlu1 %1603 }
 0x14e   : > { %v1679_v43 = vsel %vm3902_vm10, %v1604_v42, %v1678_v24  ;;  %v2077_v35 = vld [vmem:[#allocation2 + $0x68] sm:$0xff]  ;;  %v990_v46 = vpop.permute.xlu0 %989 }
 0x14f   : > { %1680 = vst [vmem:[#allocation2 + $0x78] sm:$0x7f] %v1679_v43  ;;  %1990 = vrot.lane.b32.xlu0 %v2076_v25, %s3296_s26  ;;  %1932 = vst.msk [vmem:[#allocation3 + $0xd0] sm:$0xff] %vm1918_vm15, %v2077_v35  ;;  %v1066_v54 = vsel %vm3851_vm3, %v990_v46, %v1065_v22  ;;  %v2072_v2 = vld [vmem:[#allocation2 + $0x40] sm:$0xff] }
 0x150   : > { %2061 = vst.msk [vmem:[#allocation3 + $0xb8] sm:$0xff] %vm1918_vm15, %v2077_v35  ;;  %1067 = vst [vmem:[#allocation2 + $0x80] sm:$0xff] %v1066_v54  ;;  %2109 = vrot.lane.b32.xlu1 %v2072_v2, %s3296_s26 }
 0x151   : > { %v1574_v58 = vpop.permute.xlu1 %1573  ;;  %1927 = vst.msk [vmem:[#allocation3 + $0x80] sm:$0xff] %vm1918_vm15, %v2072_v2  ;;  %2056 = vst.msk [vmem:[#allocation3 + $0x68] sm:$0xff] %vm1918_vm15, %v2072_v2 }
 0x152   : > { %v1634_v30 = vsel %vm3902_vm10, %v1574_v58, %v1633_v52  ;;  %v1376_v36 = vpop.permute.xlu0 %1375  ;;  %v1887_v63 = vld [vmem:[#allocation2 + $0x70] sm:$0xc0] }
 0x153   : > { %1635 = vst [vmem:[#allocation2] sm:$0x7f] %v1634_v30  ;;  %1982 = vrot.lane.b32.xlu0 %v2072_v2, %s3296_s26  ;;  %1417 = vst.msk [vmem:[#allocation2 + $0x80] sm:$0x7f] %vm1400_vm4, %v1376_v36 }
 0x154   : > { %2119 = vrot.lane.b32.xlu1 %v2077_v35, %s3296_s26 }
 0x155   : > { %v1440_v45 = vpop.permute.xlu1 %1439 }
 0x156   : > { %1497 = vst.msk [vmem:[#allocation2] sm:$0x80] %vm1496_vm11, %v1440_v45  ;;  %v1470_v50 = vpop.permute.xlu0 %1469 }
 0x157   : > { %1992 = vrot.lane.b32.xlu0 %v2077_v35, %s3296_s26  ;;  %1512 = vst.msk [vmem:[#allocation2 + $0x78] sm:$0x80] %vm1496_vm11, %v1470_v50  ;;  %v1315_v51 = vld [vmem:[#allocation2 + $0x80] sm:$0x80] }
 0x158   : > { %2111 = vrot.lane.b32.xlu1 %v4256_v17, %s3296_s26 }
 0x159   : > { %v3196_v59 = vpop.permute.xlu1 %3195 }
 0x15a   : > { %v3197_v29 = vunpack.i.l.bf16 %v3196_v59  ;;  %v1814_v56 = vpop.permute.xlu0 %1813  ;;  %v1681_v4 = vld [vmem:[#allocation2 + $0x80] sm:$0x7f]  ;;  %v3198_v16 = vunpack.i.h.bf16 %v3196_v59 }
 0x15b   : > { %v1888_v28 = vsel %vm3954_vm14, %v1814_v56, %v1887_v63 }
 0x15c   : > { %v1316_v39 = vsel %vm3883_vm7, %v3197_v29, %v1315_v51  ;;  %1889 = vst [vmem:[#allocation2 + $0x70] sm:$0xc0] %v1888_v28 }
 0x15d   : > { %1317 = vst [vmem:[#allocation2 + $0x80] sm:$0x80] %v1316_v39  ;;  %v1606_v48 = vpop.permute.xlu1 %1605  ;;  %v1845_v57 = vld [vmem:[#allocation2] sm:$0xc0] }
 0x15e   : > { %v1682_v41 = vsel %vm3902_vm10, %v1606_v48, %v1681_v4  ;;  %v992_v17 = vpop.permute.xlu0 %991  ;;  %v1890_v38 = vld [vmem:[#allocation2 + $0x78] sm:$0xc0] }
 0x15f   : > { %1683 = vst [vmem:[#allocation2 + $0x80] sm:$0x7f] %v1682_v41  ;;  %v1069_v53 = vsel %vm3851_vm3, %v992_v17, %v1068_v27 }
 0x160   : > { %1070 = vst [vmem:[#allocation2 + $0x88] sm:$0xff] %v1069_v53 }
 0x161   : > { %v1816_v31 = vpop.permute.xlu1 %1815 }
 0x162   : > { %v1891_v20 = vsel %vm3954_vm14, %v1816_v31, %v1890_v38  ;;  %v1378_v40 = vpop.permute.xlu0 %1377 }
 0x163   : > { %1892 = vst [vmem:[#allocation2 + $0x78] sm:$0xc0] %v1891_v20  ;;  %1418 = vst.msk [vmem:[#allocation2 + $0x88] sm:$0x7f] %vm1400_vm4, %v1378_v40  ;;  %v2078_v8 = vld [vmem:[#allocation2 + $0x70] sm:$0xff] }
 0x164   : > { %2121 = vrot.lane.b32.xlu1 %v2078_v8, %s3296_s26  ;;  %1994 = vrot.lane.b32.xlu0 %v2078_v8, %s3296_s26  ;;  %2062 = vst.msk [vmem:[#allocation3 + $0xc8] sm:$0xff] %vm1918_vm15, %v2078_v8  ;;  %1933 = vst.msk [vmem:[#allocation3 + $0xe0] sm:$0xff] %vm1918_vm15, %v2078_v8 }
 0x165   : > { %v994_v10 = vpop.permute.xlu1 %993 }
 0x166   : > { %v1072_v15 = vsel %vm3851_vm3, %v994_v10, %v1071_v21  ;;  %v1472_v19 = vpop.permute.xlu0 %1471  ;;  %vm2735_vm3 = vcmask 1042432  }
 0x167   : > { %1073 = vst [vmem:[#allocation2 + $0x90] sm:$0xff] %v1072_v15  ;;  %v1318_v60 = vld [vmem:[#allocation2 + $0x88] sm:$0x80]  ;;  %1513 = vst.msk [vmem:[#allocation2 + $0x80] sm:$0x80] %vm1496_vm11, %v1472_v19 }
 0x168   : > { %v1319_v62 = vsel %vm3883_vm7, %v3198_v16, %v1318_v60  ;;  %2113 = vrot.lane.b32.xlu1 %v4289_v7, %s3296_s26 }
 0x169   : > { %v1608_v47 = vpop.permute.xlu1 %1607  ;;  %1320 = vst [vmem:[#allocation2 + $0x88] sm:$0x80] %v1319_v62 }
 0x16a   : > { %v2079_v14 = vld [vmem:[#allocation2 + $0x78] sm:$0xff]  ;;  %v1786_v44 = vpop.permute.xlu0 %1785  ;;  %v1684_v26 = vld [vmem:[#allocation2 + $0x88] sm:$0x7f] }
 0x16b   : > { %1996 = vrot.lane.b32.xlu0 %v2079_v14, %s3296_s26  ;;  %2063 = vst.msk [vmem:[#allocation3 + $0xd8] sm:$0xff] %vm1918_vm15, %v2079_v14  ;;  %1934 = vst.msk [vmem:[#allocation3 + $0xf0] sm:$0xff] %vm1918_vm15, %v2079_v14  ;;  %v1846_v11 = vsel %vm3954_vm14, %v1786_v44, %v1845_v57  ;;  %v1685_v25 = vsel %vm3902_vm10, %v1608_v47, %v1684_v26 }
 0x16c   : > { %1847 = vst [vmem:[#allocation2] sm:$0xc0] %v1846_v11  ;;  %1686 = vst [vmem:[#allocation2 + $0x88] sm:$0x7f] %v1685_v25  ;;  %2123 = vrot.lane.b32.xlu1 %v2079_v14, %s3296_s26 }
 0x16d   : > { %v1818_v7 = vpop.permute.xlu1 %1817 }
 0x16e   : > { %v1380_v32 = vpop.permute.xlu0 %1379  ;;  %v1893_v6 = vld [vmem:[#allocation2 + $0x80] sm:$0xc0]  ;;  %v1321_v34 = vld [vmem:[#allocation2 + $0x90] sm:$0x80] }
 0x16f   : > { %1419 = vst.msk [vmem:[#allocation2 + $0x90] sm:$0x7f] %vm1400_vm4, %v1380_v32  ;;  %v1894_v61 = vsel %vm3954_vm14, %v1818_v7, %v1893_v6  ;;  %vm2740_vm4 = vcmask 1043456  }
 0x170   : > { %1895 = vst [vmem:[#allocation2 + $0x80] sm:$0xc0] %v1894_v61 }
 0x171   : > { %v1969_v55 = vpop.permute.xlu1 %1968 }
 0x172   : > { %v1474_v18 = vpop.permute.xlu0 %1473 }
 0x173   : > { %1514 = vst.msk [vmem:[#allocation2 + $0x88] sm:$0x80] %vm1496_vm11, %v1474_v18  ;;  %v1902_v49 = vld [vmem:[#allocation2] sm:$0xff] }
 0x174   : > { %1919 = vst.msk [vmem:[#allocation3] sm:$0xff] %vm1918_vm15, %v1902_v49 }
 0x175   : > { %v1610_v33 = vpop.permute.xlu1 %1609  ;;  %2017 = vst.msk [vmem:[#allocation3] sm:$0xff] %vm2016_vm0, %v1969_v55 }
 0x176   : > { %v2100_v37 = vpop.permute.xlu0 %2099  ;;  %v1687_v23 = vld [vmem:[#allocation2 + $0x90] sm:$0x7f] }
 0x177   : > { %2147 = vst.msk [vmem:[#allocation3 + $0x8] sm:$0xff] %vm2016_vm0, %v2100_v37  ;;  %v1688_v0 = vsel %vm3902_vm10, %v1610_v33, %v1687_v23  ;;  %v2080_v3 = vld [vmem:[#allocation2 + $0x80] sm:$0xff] }
 0x178   : > { %1689 = vst [vmem:[#allocation2 + $0x90] sm:$0x7f] %v1688_v0  ;;  %2125 = vrot.lane.b32.xlu1 %v2080_v3, %s3296_s26  ;;  %1998 = vrot.lane.b32.xlu0 %v2080_v3, %s3296_s26  ;;  %2064 = vst.msk [vmem:[#allocation3 + $0xe8] sm:$0xff] %vm1918_vm15, %v2080_v3 }
 0x179   : > { %v1820_v5 = vpop.permute.xlu1 %1819 }
 0x17a   : > { %v1244_v9 = vpop.permute.xlu0 %1243  ;;  %v1896_v22 = vld [vmem:[#allocation2 + $0x88] sm:$0xc0] }
 0x17b   : > { %v1322_v24 = vsel %vm3883_vm7, %v1244_v9, %v1321_v34  ;;  %v1897_v42 = vsel %vm3954_vm14, %v1820_v5, %v1896_v22  ;;  %vm2755_vm7 = vcmask 1046528  }
 0x17c   : > { %1323 = vst [vmem:[#allocation2 + $0x90] sm:$0x80] %v1322_v24  ;;  %1898 = vst [vmem:[#allocation2 + $0x88] sm:$0xc0] %v1897_v42  ;;  %v2163_v46 = vld [vmem:[#allocation3] sm:$0xff] }
 0x17d   : > { %v1971_v1 = vpop.permute.xlu1 %1970 }
 0x17e   : > { %2018 = vst.msk [vmem:[#allocation3 + $0x10] sm:$0xff] %vm2016_vm0, %v1971_v1  ;;  %v1476_v43 = vpop.permute.xlu0 %1475  ;;  %v2164_v35 = vld [vmem:[#allocation3 + $0x8] sm:$0xff] }
 0x17f   : > { %1515 = vst.msk [vmem:[#allocation2 + $0x90] sm:$0x80] %vm1496_vm11, %v1476_v43  ;;  %2362 = vmatprep.mubr.bf16.mxu0 %v2164_v35 }
 0x180   : > { %2363 = vmatmul.mubr.bf16.vlgmr.msra.gmra.mrb[0].mxu0 %v2163_v46 }
 0x181   : > { %v2104_v54 = vpop.permute.xlu1 %2103 }
 0x182   : > { %2149 = vst.msk [vmem:[#allocation3 + $0x28] sm:$0xff] %vm2016_vm0, %v2104_v54  ;;  %v2102_v13 = vpop.permute.xlu0 %2101 }
 0x183   : > { %2148 = vst.msk [vmem:[#allocation3 + $0x18] sm:$0xff] %vm2016_vm0, %v2102_v13  ;;  %v2081_v2 = vld [vmem:[#allocation2 + $0x88] sm:$0xff] }
 0x184   : > { %2127 = vrot.lane.b32.xlu1 %v2081_v2, %s3296_s26  ;;  %2065 = vst.msk [vmem:[#allocation3 + $0xf8] sm:$0xff] %vm1918_vm15, %v2081_v2 }
 0x185   : > { %v2165_v50 = vld [vmem:[#allocation3 + $0x10] sm:$0xff] }
 0x186   : > { %v1822_v58 = vpop.permute.xlu0 %1821  ;;  %v1899_v52 = vld [vmem:[#allocation2 + $0x90] sm:$0xc0] }
 0x187   : > { %v1900_v30 = vsel %vm3954_vm14, %v1822_v58, %v1899_v52 }
 0x188   : > { %1901 = vst [vmem:[#allocation2 + $0x90] sm:$0xc0] %v1900_v30  ;;  %v4426_v30 = vld [vmem:[%s4518_s3] ss:$0 sm:$0xff] }
 0x189   : > { %v2168_v59 = vld [vmem:[#allocation3 + $0x28] sm:$0xff] }
 0x18a   : > { %v1973_v36 = vpop.permute.xlu0 %1972  ;;  %v2166_v45 = vld [vmem:[#allocation3 + $0x18] sm:$0xff] }
 0x18b   : > { %2019 = vst.msk [vmem:[#allocation3 + $0x20] sm:$0xff] %vm2016_vm0, %v1973_v36  ;;  %2370 = vmatprep.mubr.bf16.mxu0 %v2166_v45 }
 0x18c   : > { %2371 = vmatmul.mubr.bf16.gmra.mrb[4].mxu0 %v2165_v50 }
 0x18d   : > { %2378 = vmatprep.mubr.bf16.mxu0 %v2168_v59 }
 0x18e   : > { %v1975_v29 = vpop.permute.xlu0 %1974 }
 0x18f   : > { %2020 = vst.msk [vmem:[#allocation3 + $0x30] sm:$0xff] %vm2016_vm0, %v1975_v29  ;;  %v2082_v56 = vld [vmem:[#allocation2 + $0x90] sm:$0xff] }
 0x190   : > { %2129 = vrot.lane.b32.xlu1 %v2082_v56, %s3296_s26 }
 0x192   : > { %v2167_v63 = vld [vmem:[#allocation3 + $0x20] sm:$0xff] }
 0x194   : > { %2379 = vmatmul.mubr.bf16.gmra.mrb[8].mxu0 %v2167_v63 }
 0x196   : > { %v2169_v4 = vld [vmem:[#allocation3 + $0x30] sm:$0xff] }
 0x19a   : > { %v2106_v12 = vpop.permute.xlu1 %2105 }
 0x19b   : > { %2150 = vst.msk [vmem:[#allocation3 + $0x38] sm:$0xff] %vm2016_vm0, %v2106_v12 }
 0x19d   : > { %v1985_v51 = vpop.permute.xlu0 %1984 }
 0x19e   : > { %2025 = vst.msk [vmem:[#allocation3 + $0x80] sm:$0xff] %vm2016_vm0, %v1985_v51  ;;  %v2116_v28 = vpop.permute.xlu1 %2115 }
 0x19f   : > { %2155 = vst.msk [vmem:[#allocation3 + $0x88] sm:$0xff] %vm2016_vm0, %v2116_v28 }
 0x1a1   : > { %v1977_v39 = vpop.permute.xlu0 %1976 }
 0x1a2   : > { %2021 = vst.msk [vmem:[#allocation3 + $0x40] sm:$0xff] %vm2016_vm0, %v1977_v39  ;;  %v2170_v27 = vld [vmem:[#allocation3 + $0x38] sm:$0xff] }
 0x1a3   : > { %2386 = vmatprep.mubr.bf16.mxu0 %v2170_v27  ;;  %v3297_v27 = vmov 0.0  }
 0x1a4   : > { %2387 = vmatmul.mubr.bf16.gmra.mrb[12].mxu0 %v2169_v4  ;;  %v4430_v4 = vrot.slane %v3297_v27, 7 }
 0x1a5   : > { %v2179_v48 = vld [vmem:[#allocation3 + $0x80] sm:$0xff] }
 0x1a6   : > { %v2180_v41 = vld [vmem:[#allocation3 + $0x88] sm:$0xff] }
 0x1a7   : > { %2426 = vmatprep.mubr.bf16.mxu1 %v2180_v41 }
 0x1a8   : > { %2427 = vmatmul.mubr.bf16.vlgmr.msra.gmra.mrb[0].mxu1 %v2179_v48 }
 0x1a9   : > { %v2171_v21 = vld [vmem:[#allocation3 + $0x40] sm:$0xff] }
 0x1b1   : > { %v1987_v17 = vpop.permute.xlu0 %1986 }
 0x1b2   : > { %2026 = vst.msk [vmem:[#allocation3 + $0x90] sm:$0xff] %vm2016_vm0, %v1987_v17  ;;  %v2108_v53 = vpop.permute.xlu1 %2107 }
 0x1b3   : > { %2151 = vst.msk [vmem:[#allocation3 + $0x48] sm:$0xff] %vm2016_vm0, %v2108_v53 }
 0x1b5   : > { %v1979_v31 = vpop.permute.xlu0 %1978 }
 0x1b6   : > { %2022 = vst.msk [vmem:[#allocation3 + $0x50] sm:$0xff] %vm2016_vm0, %v1979_v31  ;;  %v2118_v38 = vpop.permute.xlu1 %2117 }
 0x1b7   : > { %2156 = vst.msk [vmem:[#allocation3 + $0x98] sm:$0xff] %vm2016_vm0, %v2118_v38 }
 0x1b9   : > { %v1989_v20 = vpop.permute.xlu0 %1988  ;;  %v2181_v15 = vld [vmem:[#allocation3 + $0x90] sm:$0xff] }
 0x1ba   : > { %2027 = vst.msk [vmem:[#allocation3 + $0xa0] sm:$0xff] %vm2016_vm0, %v1989_v20  ;;  %v2172_v40 = vld [vmem:[#allocation3 + $0x48] sm:$0xff] }
 0x1bb   : > { %2394 = vmatprep.mubr.bf16.mxu0 %v2172_v40 }
 0x1bc   : > { %2395 = vmatmul.mubr.bf16.gmra.mrb[16].mxu0 %v2171_v21 }
 0x1bd   : > { %v1981_v8 = vpop.permute.xlu0 %1980  ;;  %v2173_v57 = vld [vmem:[#allocation3 + $0x50] sm:$0xff] }
 0x1be   : > { %2023 = vst.msk [vmem:[#allocation3 + $0x60] sm:$0xff] %vm2016_vm0, %v1981_v8  ;;  %v2182_v10 = vld [vmem:[#allocation3 + $0x98] sm:$0xff] }
 0x1bf   : > { %2432 = vmatprep.mubr.bf16.mxu1 %v2182_v10 }
 0x1c0   : > { %2433 = vmatmul.mubr.bf16.gmra.mrb[4].mxu1 %v2181_v15 }
 0x1c1   : > { %v1991_v16 = vpop.permute.xlu0 %1990  ;;  %v2183_v11 = vld [vmem:[#allocation3 + $0xa0] sm:$0xff] }
 0x1c2   : > { %2028 = vst.msk [vmem:[#allocation3 + $0xb0] sm:$0xff] %vm2016_vm0, %v1991_v16  ;;  %v2110_v19 = vpop.permute.xlu1 %2109 }
 0x1c3   : > { %2152 = vst.msk [vmem:[#allocation3 + $0x58] sm:$0xff] %vm2016_vm0, %v2110_v19 }
 0x1c5   : > { %v1983_v60 = vpop.permute.xlu0 %1982  ;;  %v2175_v7 = vld [vmem:[#allocation3 + $0x60] sm:$0xff] }
 0x1c6   : > { %2024 = vst.msk [vmem:[#allocation3 + $0x70] sm:$0xff] %vm2016_vm0, %v1983_v60  ;;  %v2120_v62 = vpop.permute.xlu1 %2119 }
 0x1c7   : > { %2157 = vst.msk [vmem:[#allocation3 + $0xa8] sm:$0xff] %vm2016_vm0, %v2120_v62 }
 0x1c9   : > { %v1993_v47 = vpop.permute.xlu0 %1992  ;;  %v2185_v33 = vld [vmem:[#allocation3 + $0xb0] sm:$0xff] }
 0x1ca   : > { %2029 = vst.msk [vmem:[#allocation3 + $0xc0] sm:$0xff] %vm2016_vm0, %v1993_v47  ;;  %v2112_v14 = vpop.permute.xlu1 %2111  ;;  %v2174_v44 = vld [vmem:[#allocation3 + $0x58] sm:$0xff] }
 0x1cb   : > { %2153 = vst.msk [vmem:[#allocation3 + $0x68] sm:$0xff] %vm2016_vm0, %v2112_v14  ;;  %2402 = vmatprep.mubr.bf16.mxu0 %v2174_v44 }
 0x1cc   : > { %2403 = vmatmul.mubr.bf16.gmra.mrb[20].mxu0 %v2173_v57  ;;  %v4438_v57 = vrot.slane %v4430_v4, 2 }
 0x1cd   : > { %v2177_v23 = vld [vmem:[#allocation3 + $0x70] sm:$0xff] }
 0x1ce   : > { %v2184_v26 = vld [vmem:[#allocation3 + $0xa8] sm:$0xff] }
 0x1cf   : > { %2438 = vmatprep.mubr.bf16.mxu1 %v2184_v26 }
 0x1d0   : > { %2439 = vmatmul.mubr.bf16.gmra.mrb[8].mxu1 %v2183_v11 }
 0x1d1   : > { %v2187_v3 = vld [vmem:[#allocation3 + $0xc0] sm:$0xff] }
 0x1d2   : > { %v2176_v25 = vld [vmem:[#allocation3 + $0x68] sm:$0xff] }
 0x1d3   : > { %2410 = vmatprep.mubr.bf16.mxu0 %v2176_v25 }
 0x1d4   : > { %2411 = vmatmul.mubr.bf16.gmra.mrb[24].mxu0 %v2175_v7 }
 0x1d6   : > { %v1995_v32 = vpop.permute.xlu0 %1994  ;;  %v2122_v6 = vpop.permute.xlu1 %2121 }
 0x1d7   : > { %2030 = vst.msk [vmem:[#allocation3 + $0xd0] sm:$0xff] %vm2016_vm0, %v1995_v32  ;;  %2158 = vst.msk [vmem:[#allocation3 + $0xb8] sm:$0xff] %vm2016_vm0, %v2122_v6 }
 0x1da   : > { %v2114_v61 = vpop.permute.xlu1 %2113 }
 0x1db   : > { %2154 = vst.msk [vmem:[#allocation3 + $0x78] sm:$0xff] %vm2016_vm0, %v2114_v61 }
 0x1dd   : > { %v1997_v55 = vpop.permute.xlu0 %1996 }
 0x1de   : > { %2031 = vst.msk [vmem:[#allocation3 + $0xe0] sm:$0xff] %vm2016_vm0, %v1997_v55  ;;  %v2124_v18 = vpop.permute.xlu1 %2123  ;;  %v2186_v49 = vld [vmem:[#allocation3 + $0xb8] sm:$0xff]  ;;  %v2189_v22 = vld [vmem:[#allocation3 + $0xd0] sm:$0xff] }
 0x1df   : > { %2159 = vst.msk [vmem:[#allocation3 + $0xc8] sm:$0xff] %vm2016_vm0, %v2124_v18  ;;  %2444 = vmatprep.mubr.bf16.mxu1 %v2186_v49 }
 0x1e0   : > { %2445 = vmatmul.mubr.bf16.gmra.mrb[12].mxu1 %v2185_v33 }
 0x1e2   : > { %v2178_v37 = vld [vmem:[#allocation3 + $0x78] sm:$0xff] }
 0x1e3   : > { %2418 = vmatprep.mubr.bf16.mxu0 %v2178_v37 }
 0x1e4   : > { %2419 = vmatmul.mubr.bf16.gmra.mrb[28].mxu0 %v2177_v23 }
 0x1e5   : > { %v2191_v1 = vld [vmem:[#allocation3 + $0xe0] sm:$0xff] }
 0x1e6   : > { %v2188_v0 = vld [vmem:[#allocation3 + $0xc8] sm:$0xff] }
 0x1e7   : > { %2450 = vmatprep.mubr.bf16.mxu1 %v2188_v0 }
 0x1e8   : > { %2451 = vmatmul.mubr.bf16.gmra.mrb[16].mxu1 %v2187_v3 }
 0x1ea   : > { %v2126_v5 = vpop.permute.xlu1 %2125  ;;  %v1999_v9 = vpop.permute.xlu0 %1998 }
 0x1eb   : > { %2160 = vst.msk [vmem:[#allocation3 + $0xd8] sm:$0xff] %vm2016_vm0, %v2126_v5  ;;  %2032 = vst.msk [vmem:[#allocation3 + $0xf0] sm:$0xff] %vm2016_vm0, %v1999_v9 }
 0x1f2   : > { %v2190_v34 = vld [vmem:[#allocation3 + $0xd8] sm:$0xff]  ;;  %v2193_v46 = vld [vmem:[#allocation3 + $0xf0] sm:$0xff] }
 0x1f3   : > { %2456 = vmatprep.mubr.bf16.mxu1 %v2190_v34 }
 0x1f4   : > { %2457 = vmatmul.mubr.bf16.gmra.mrb[20].mxu1 %v2189_v22 }
 0x1f6   : > { %v2128_v24 = vpop.permute.xlu1 %2127 }
 0x1f7   : > { %2161 = vst.msk [vmem:[#allocation3 + $0xe8] sm:$0xff] %vm2016_vm0, %v2128_v24 }
 0x1fe   : > { %v2192_v42 = vld [vmem:[#allocation3 + $0xe8] sm:$0xff] }
 0x1ff   : > { %2462 = vmatprep.mubr.bf16.mxu1 %v2192_v42 }
 0x200   : > { %2463 = vmatmul.mubr.bf16.gmra.mrb[24].mxu1 %v2191_v1 }
 0x202   : > { %v2130_v43 = vpop.permute.xlu1 %2129 }
 0x203   : > { %2162 = vst.msk [vmem:[#allocation3 + $0xf8] sm:$0xff] %vm2016_vm0, %v2130_v43 }
 0x20a   : > { %v2194_v35 = vld [vmem:[#allocation3 + $0xf8] sm:$0xff] }
 0x20b   : > { %2468 = vmatprep.mubr.bf16.mxu1 %v2194_v35 }
 0x20c   : > { %2469 = vmatmul.mubr.bf16.gmra.mrb[28].mxu1 %v2193_v46 }
 0x253   : > { %v2993_v54 = vpop.f32.mrb[0].mxu0 }
 0x254   : > { %v2994_v13 = vpop.f32.mrb[1].mxu0 }
 0x255   : > { %v2995_v2 = vadd.f32 %v2994_v13, %v2993_v54  ;;  %v2996_v58 = vpop.f32.mrb[2].mxu0 }
 0x256   : > { %v2997_v52 = vpop.f32.mrb[3].mxu0 }
 0x257   : > { %v2365_v36 = vadd.f32 %v2995_v2, %v4426_v30 }
 0x259   : > { %v2475_v59 = vmax.f32 %v2365_v36, 0.0 }
 0x25b   : > { %v2520_v51 = vmax.f32 %v2475_v59, 0.0 }
 0x25f   : > { %v2999_v45 = vpop.f32.mrb[4].mxu0 }
 0x260   : > { %v3000_v50 = vpop.f32.mrb[5].mxu0 }
 0x261   : > { %v3001_v29 = vadd.f32 %v3000_v50, %v2999_v45  ;;  %v3002_v56 = vpop.f32.mrb[6].mxu0 }
 0x262   : > { %v3003_v63 = vpop.f32.mrb[7].mxu0 }
 0x263   : > { %v2373_v12 = vadd.f32 %v3001_v29, %v4426_v30 }
 0x265   : > { %v2477_v28 = vmax.f32 %v2373_v12, 0.0 }
 0x267   : > { %v2528_v39 = vmax.f32 %v2520_v51, %v2477_v28  ;;  %v3005_v48 = vpop.f32.mrb[8].mxu0 }
 0x268   : > { %v3006_v41 = vpop.f32.mrb[9].mxu0 }
 0x269   : > { %v2562_v17 = vrot.slane %v2528_v39, 7  ;;  %v3007_v53 = vadd.f32 %v3006_v41, %v3005_v48  ;;  %v3008_v31 = vpop.f32.mrb[10].mxu0 }
 0x26a   : > { %v3009_v38 = vpop.f32.mrb[11].mxu0 }
 0x26b   : > { %v2564_v20 = vsel %vm2561_vm1, %v2562_v17, %v4430_v4  ;;  %v2582_v40 = vsel %vm2561_vm1, 0.0, %v2562_v17  ;;  %v2381_v21 = vadd.f32 %v3007_v53, %v4426_v30 }
 0x26c   : > { %v2590_v8 = vrot.slane %v2582_v40, 1  ;;  %v2626_v10 = vrot.slane %v2564_v20, 1  ;;  %v2602_v19 = vrot.slane %v2582_v40, 2  ;;  %v2614_v60 = vrot.slane %v2564_v20, 2 }
 0x26d   : > { %v2479_v15 = vmax.f32 %v2381_v21, 0.0 }
 0x26e   : > { %v2598_v16 = vmax.f32 %v2582_v40, %v2590_v8  ;;  %v2634_v62 = vmax.f32 %v2564_v20, %v2626_v10 }
 0x26f   : > { %v2522_v47 = vmax.f32 %v2477_v28, %v2479_v15 }
 0x270   : > { %v2610_v14 = vmax.f32 %v2598_v16, %v2602_v19  ;;  %v2622_v44 = vmax.f32 %v2598_v16, %v2614_v60  ;;  %v2638_v26 = vmax.f32 %v2634_v62, %v2614_v60  ;;  %v2650_v7 = vmax.f32 %v2634_v62, %v4438_v57 }
 0x272   : > { %v2658_v11 = vrot.slane %v2610_v14, 1  ;;  %v2666_v25 = vrot.slane %v2610_v14, 2  ;;  %v2678_v32 = vrot.slane %v2622_v44, 3  ;;  %v2690_v61 = vrot.slane %v2638_v26, 4 }
 0x273   : > { %v2698_v18 = vrot.slane %v2638_v26, 5  ;;  %v2706_v33 = vrot.slane %v2638_v26, 6  ;;  %v2718_v0 = vrot.slane %v2650_v7, 7 }
 0x274   : > { %v2726_v6 = vsel %vm2561_vm1, %v2610_v14, %v2658_v11 }
 0x275   : > { %v2731_v55 = vsel %vm2730_vm2, %v2726_v6, %v2666_v25 }
 0x276   : > { %v2736_v49 = vsel %vm2735_vm3, %v2731_v55, %v2678_v32 }
 0x277   : > { %v2741_v37 = vsel %vm2740_vm4, %v2736_v49, %v2690_v61  ;;  %v3011_v23 = vpop.f32.mrb[12].mxu0 }
 0x278   : > { %v2746_v3 = vsel %vm2745_vm5, %v2741_v37, %v2698_v18  ;;  %v3012_v5 = vpop.f32.mrb[13].mxu0 }
 0x279   : > { %v2751_v9 = vsel %vm2750_vm6, %v2746_v3, %v2706_v33  ;;  %v3013_v34 = vadd.f32 %v3012_v5, %v3011_v23  ;;  %v3014_v22 = vpop.f32.mrb[14].mxu0 }
 0x27a   : > { %v2756_v24 = vsel %vm2755_vm7, %v2751_v9, %v2718_v0  ;;  %v3015_v42 = vpop.f32.mrb[15].mxu0 }
 0x27b   : > { %2760 = vst.msk [vmem:[%s4449_s28] sm:$0xff] %vm1918_vm15, %v2756_v24  ;;  %v2389_v1 = vadd.f32 %v3013_v34, %v4426_v30  ;;  %v3041_v43 = vpop.f32.mrb[0].mxu1 }
 0x27c   : > { %v3042_v35 = vpop.f32.mrb[1].mxu1 }
 0x27d   : > { %v2481_v46 = vmax.f32 %v2389_v1, 0.0  ;;  %v3044_v54 = vpop.f32.mrb[2].mxu1 }
 0x27e   : > { %v3045_v13 = vpop.f32.mrb[3].mxu1 }
 0x27f   : > { %v2530_v2 = vmax.f32 %v2522_v47, %v2481_v46 }
 0x281   : > { %v2565_v58 = vrot.slane %v2530_v2, 7 }
 0x283   : > { %v2567_v52 = vsel %vm2561_vm1, %v2565_v58, %v4430_v4  ;;  %v2583_v36 = vsel %vm2561_vm1, 0.0, %v2565_v58 }
 0x284   : > { %v2591_v45 = vrot.slane %v2583_v36, 1  ;;  %v2627_v50 = vrot.slane %v2567_v52, 1  ;;  %v2603_v29 = vrot.slane %v2583_v36, 2  ;;  %v2615_v56 = vrot.slane %v2567_v52, 2 }
 0x286   : > { %v2599_v59 = vmax.f32 %v2583_v36, %v2591_v45  ;;  %v2635_v63 = vmax.f32 %v2567_v52, %v2627_v50 }
 0x288   : > { %v2611_v12 = vmax.f32 %v2599_v59, %v2603_v29  ;;  %v2623_v51 = vmax.f32 %v2599_v59, %v2615_v56  ;;  %v2639_v28 = vmax.f32 %v2635_v63, %v2615_v56  ;;  %v2651_v48 = vmax.f32 %v2635_v63, %v4438_v57 }
 0x28a   : > { %v2659_v39 = vrot.slane %v2611_v12, 1  ;;  %v2667_v27 = vrot.slane %v2611_v12, 2  ;;  %v2679_v41 = vrot.slane %v2623_v51, 3  ;;  %v2691_v53 = vrot.slane %v2639_v28, 4 }
 0x28b   : > { %v2699_v38 = vrot.slane %v2639_v28, 5  ;;  %v2707_v40 = vrot.slane %v2639_v28, 6  ;;  %v2719_v10 = vrot.slane %v2651_v48, 7 }
 0x28c   : > { %v2727_v17 = vsel %vm2561_vm1, %v2611_v12, %v2659_v39 }
 0x28d   : > { %v2732_v31 = vsel %vm2730_vm2, %v2727_v17, %v2667_v27 }
 0x28e   : > { %v2737_v20 = vsel %vm2735_vm3, %v2732_v31, %v2679_v41 }
 0x28f   : > { %v2742_v21 = vsel %vm2740_vm4, %v2737_v20, %v2691_v53  ;;  %v3017_v8 = vpop.f32.mrb[16].mxu0 }
 0x290   : > { %v2747_v15 = vsel %vm2745_vm5, %v2742_v21, %v2699_v38  ;;  %v3018_v16 = vpop.f32.mrb[17].mxu0 }
 0x291   : > { %v2752_v19 = vsel %vm2750_vm6, %v2747_v15, %v2707_v40  ;;  %v3019_v60 = vadd.f32 %v3018_v16, %v3017_v8  ;;  %v3020_v62 = vpop.f32.mrb[18].mxu0 }
 0x292   : > { %v2757_v47 = vsel %vm2755_vm7, %v2752_v19, %v2719_v10  ;;  %v3021_v14 = vpop.f32.mrb[19].mxu0 }
 0x293   : > { %2761 = vst.msk [vmem:[%s4449_s28 + $0x8] sm:$0xff] %vm1918_vm15, %v2757_v47  ;;  %v2397_v44 = vadd.f32 %v3019_v60, %v4426_v30  ;;  %v3047_v26 = vpop.f32.mrb[4].mxu1 }
 0x294   : > { %v3048_v11 = vpop.f32.mrb[5].mxu1 }
 0x295   : > { %v2483_v25 = vmax.f32 %v2397_v44, 0.0  ;;  %v3050_v7 = vpop.f32.mrb[6].mxu1 }
 0x296   : > { %v3051_v32 = vpop.f32.mrb[7].mxu1 }
 0x297   : > { %v2524_v6 = vmax.f32 %v2481_v46, %v2483_v25 }
 0x29f   : > { %v3023_v61 = vpop.f32.mrb[20].mxu0 }
 0x2a0   : > { %v3024_v55 = vpop.f32.mrb[21].mxu0 }
 0x2a1   : > { %v3025_v18 = vadd.f32 %v3024_v55, %v3023_v61  ;;  %v3026_v49 = vpop.f32.mrb[22].mxu0 }
 0x2a2   : > { %v3027_v33 = vpop.f32.mrb[23].mxu0 }
 0x2a3   : > { %v2405_v37 = vadd.f32 %v3025_v18, %v4426_v30  ;;  %v3053_v23 = vpop.f32.mrb[8].mxu1 }
 0x2a4   : > { %v3054_v0 = vpop.f32.mrb[9].mxu1 }
 0x2a5   : > { %v2485_v3 = vmax.f32 %v2405_v37, 0.0  ;;  %v3056_v5 = vpop.f32.mrb[10].mxu1 }
 0x2a6   : > { %v3057_v9 = vpop.f32.mrb[11].mxu1 }
 0x2a7   : > { %v2532_v34 = vmax.f32 %v2524_v6, %v2485_v3  ;;  %v3029_v22 = vpop.f32.mrb[24].mxu0 }
 0x2a8   : > { %v3030_v24 = vpop.f32.mrb[25].mxu0 }
 0x2a9   : > { %v2568_v42 = vrot.slane %v2532_v34, 7  ;;  %v3031_v1 = vadd.f32 %v3030_v24, %v3029_v22  ;;  %v3032_v43 = vpop.f32.mrb[26].mxu0 }
 0x2aa   : > { %v3033_v35 = vpop.f32.mrb[27].mxu0 }
 0x2ab   : > { %v2570_v46 = vsel %vm2561_vm1, %v2568_v42, %v4430_v4  ;;  %v2584_v54 = vsel %vm2561_vm1, 0.0, %v2568_v42  ;;  %v2413_v13 = vadd.f32 %v3031_v1, %v4426_v30 }
 0x2ac   : > { %v2592_v2 = vrot.slane %v2584_v54, 1  ;;  %v2628_v58 = vrot.slane %v2570_v46, 1  ;;  %v2604_v45 = vrot.slane %v2584_v54, 2  ;;  %v2616_v50 = vrot.slane %v2570_v46, 2 }
 0x2ad   : > { %v2487_v52 = vmax.f32 %v2413_v13, 0.0 }
 0x2ae   : > { %v2600_v36 = vmax.f32 %v2584_v54, %v2592_v2  ;;  %v2636_v59 = vmax.f32 %v2570_v46, %v2628_v58 }
 0x2af   : > { %v2526_v29 = vmax.f32 %v2485_v3, %v2487_v52 }
 0x2b0   : > { %v2612_v56 = vmax.f32 %v2600_v36, %v2604_v45  ;;  %v2624_v63 = vmax.f32 %v2600_v36, %v2616_v50  ;;  %v2640_v12 = vmax.f32 %v2636_v59, %v2616_v50  ;;  %v2652_v27 = vmax.f32 %v2636_v59, %v4438_v57 }
 0x2b2   : > { %v2660_v51 = vrot.slane %v2612_v56, 1  ;;  %v2668_v28 = vrot.slane %v2612_v56, 2  ;;  %v2680_v48 = vrot.slane %v2624_v63, 3  ;;  %v2692_v53 = vrot.slane %v2640_v12, 4 }
 0x2b3   : > { %v3059_v39 = vpop.f32.mrb[12].mxu1  ;;  %v2700_v20 = vrot.slane %v2640_v12, 5  ;;  %v2708_v8 = vrot.slane %v2640_v12, 6  ;;  %v2720_v16 = vrot.slane %v2652_v27, 7 }
 0x2b4   : > { %v2728_v41 = vsel %vm2561_vm1, %v2612_v56, %v2660_v51  ;;  %v3060_v17 = vpop.f32.mrb[13].mxu1 }
 0x2b5   : > { %v2733_v31 = vsel %vm2730_vm2, %v2728_v41, %v2668_v28  ;;  %v3062_v38 = vpop.f32.mrb[14].mxu1 }
 0x2b6   : > { %v2738_v40 = vsel %vm2735_vm3, %v2733_v31, %v2680_v48  ;;  %v3063_v21 = vpop.f32.mrb[15].mxu1 }
 0x2b7   : > { %v2743_v10 = vsel %vm2740_vm4, %v2738_v40, %v2692_v53  ;;  %v3035_v15 = vpop.f32.mrb[28].mxu0 }
 0x2b8   : > { %v2748_v19 = vsel %vm2745_vm5, %v2743_v10, %v2700_v20  ;;  %v3036_v60 = vpop.f32.mrb[29].mxu0 }
 0x2b9   : > { %v2753_v62 = vsel %vm2750_vm6, %v2748_v19, %v2708_v8  ;;  %v3037_v47 = vadd.f32 %v3036_v60, %v3035_v15  ;;  %v3038_v14 = vpop.f32.mrb[30].mxu0 }
 0x2ba   : > { %v2758_v44 = vsel %vm2755_vm7, %v2753_v62, %v2720_v16  ;;  %v3039_v26 = vpop.f32.mrb[31].mxu0 }
 0x2bb   : > { %2762 = vst.msk [vmem:[%s4449_s28 + $0x10] sm:$0xff] %vm1918_vm15, %v2758_v44  ;;  %v2421_v11 = vadd.f32 %v3037_v47, %v4426_v30  ;;  %v3065_v25 = vpop.f32.mrb[16].mxu1 }
 0x2bc   : > { %v3066_v7 = vpop.f32.mrb[17].mxu1 }
 0x2bd   : > { %v2489_v32 = vmax.f32 %v2421_v11, 0.0  ;;  %v3068_v6 = vpop.f32.mrb[18].mxu1 }
 0x2be   : > { %v3069_v61 = vpop.f32.mrb[19].mxu1 }
 0x2bf   : > { %v2534_v55 = vmax.f32 %v2526_v29, %v2489_v32 }
 0x2c1   : > { %v2571_v18 = vrot.slane %v2534_v55, 7 }
 0x2c3   : > { %v2573_v49 = vsel %vm2561_vm1, %v2571_v18, %v4430_v4  ;;  %v2585_v33 = vsel %vm2561_vm1, 0.0, %v2571_v18 }
 0x2c4   : > { %v2593_v37 = vrot.slane %v2585_v33, 1  ;;  %v2629_v23 = vrot.slane %v2573_v49, 1  ;;  %v2605_v3 = vrot.slane %v2585_v33, 2  ;;  %v2617_v5 = vrot.slane %v2573_v49, 2 }
 0x2c6   : > { %v2601_v0 = vmax.f32 %v2585_v33, %v2593_v37  ;;  %v2637_v9 = vmax.f32 %v2573_v49, %v2629_v23 }
 0x2c7   : > { %v3071_v34 = vpop.f32.mrb[20].mxu1 }
 0x2c8   : > { %v2613_v30 = vmax.f32 %v2601_v0, %v2605_v3  ;;  %v2625_v22 = vmax.f32 %v2601_v0, %v2617_v5  ;;  %v3072_v24 = vpop.f32.mrb[21].mxu1  ;;  %v2641_v42 = vmax.f32 %v2637_v9, %v2617_v5  ;;  %v2653_v4 = vmax.f32 %v2637_v9, %v4438_v57 }
 0x2c9   : > { %v3074_v1 = vpop.f32.mrb[22].mxu1 }
 0x2ca   : > { %v2661_v43 = vrot.slane %v2613_v30, 1  ;;  %v2669_v35 = vrot.slane %v2613_v30, 2  ;;  %v3075_v46 = vpop.f32.mrb[23].mxu1  ;;  %v2681_v54 = vrot.slane %v2625_v22, 3  ;;  %v2693_v2 = vrot.slane %v2641_v42, 4 }
 0x2cb   : > { %v2701_v52 = vrot.slane %v2641_v42, 5  ;;  %v2709_v45 = vrot.slane %v2641_v42, 6  ;;  %v2721_v59 = vrot.slane %v2653_v4, 7 }
 0x2cc   : > { %v2729_v13 = vsel %vm2561_vm1, %v2613_v30, %v2661_v43 }
 0x2cd   : > { %v2734_v58 = vsel %vm2730_vm2, %v2729_v13, %v2669_v35 }
 0x2ce   : > { %v2739_v36 = vsel %vm2735_vm3, %v2734_v58, %v2681_v54 }
 0x2cf   : > { %v2744_v50 = vsel %vm2740_vm4, %v2739_v36, %v2693_v2 }
 0x2d0   : > { %v2749_v29 = vsel %vm2745_vm5, %v2744_v50, %v2701_v52 }
 0x2d1   : > { %v2754_v56 = vsel %vm2750_vm6, %v2749_v29, %v2709_v45 }
 0x2d2   : > { %v2759_v63 = vsel %vm2755_vm7, %v2754_v56, %v2721_v59 }
 0x2d3   : > { %2763 = vst.msk [vmem:[%s4449_s28 + $0x18] sm:$0xff] %vm1918_vm15, %v2759_v63  ;;  %v3077_v57 = vpop.f32.mrb[24].mxu1 }
 0x2d4   : > { %v3078_v12 = vpop.f32.mrb[25].mxu1 }
 0x2d5   : > { %v3080_v51 = vpop.f32.mrb[26].mxu1 }
 0x2d6   : > { %v3081_v28 = vpop.f32.mrb[27].mxu1 }
 0x2df   : > { %v3083_v39 = vpop.f32.mrb[28].mxu1 }
 0x2e0   : > { %v3084_v27 = vpop.f32.mrb[29].mxu1 }
 0x2e1   : > { %v3086_v48 = vpop.f32.mrb[30].mxu1 }
 0x2e2   : > { %v3087_v41 = vpop.f32.mrb[31].mxu1 }
 0x2e3 PF: > { %s14_s19 = sadd.s32 1, %s3291_s19   ;;  %s4529_s15 = smov %s3279_s16 }
 0x2e4   : > { %p11_p10 = scmp.ge.s32.totalorder %s14_s19, 4   ;;  %s4530_s16 = smov %s3362_s24 }
 0x2e5   : > { %s4531_s17 = smov %s3287_s18  ;;  %s4532_s18 = smov %s4534_s20 }
 0x2e6   :  { %13 = sbr.rel (!%p11_p10) target bundleno = 3 (0x3), region = 164 }

</bundles_post_ra>
